<compile_context>
chip_gen: v5e
topology: v5e:2x2
jax: 0.10.0
libtpu: 0.0.40
codegen_flags: <defaults>
</compile_context>

<pallas_src>
import functools
import math

import jax
import jax.numpy as jnp
from jax.experimental import pallas as pl
from jax.experimental.pallas import tpu as pltpu


def _rel_attn_kernel(q_ref, k_ref, v_ref, r_ref, u_ref, vb_ref,
                     out_ref, w_ref, *, n_head, d_head):
    """Fused Transformer-XL attention core for one batch element.

    Block shapes:
      q_ref / k_ref / v_ref : (1, S, D)    projected, heads concatenated on lanes
      r_ref                 : (S, S, D)    projected relative embeddings (VMEM-resident)
      u_ref / vb_ref        : (1, D)       content / position bias, flattened (H*Dh,)
      out_ref               : (1, S, D)    pre-o_proj context, lane-dense
      w_ref                 : (1, H, S, S) attention weights
    """
    f32 = jnp.float32
    qh = q_ref[0].astype(f32)           # (S, D)
    kh = k_ref[0].astype(f32)           # (S, D)
    vh = v_ref[0].astype(f32)           # (S, D)
    rh = r_ref[...].astype(f32)         # (S, S, D)

    # u / v biases are laid out head-major along lanes, so one broadcast add
    # applies u[h] / v[h] to the correct head slice of every query row.
    q_u = qh + u_ref[...].astype(f32)   # (S, D)
    q_v = qh + vb_ref[...].astype(f32)  # (S, D)

    scale = 1.0 / math.sqrt(d_head)
    hi = jax.lax.Precision.HIGHEST
    outs = []
    for h in range(n_head):             # static unroll (n_head is small)
        sl = slice(h * d_head, (h + 1) * d_head)
        # (a)+(c): (q_i + u) . k_j  -> MXU, contract the feature dim of both.
        ac_ce = jax.lax.dot_general(
            q_u[:, sl], kh[:, sl],
            dimension_numbers=(((1,), (1,)), ((), ())),
            precision=hi, preferred_element_type=f32)          # (S, S)
        # (b)+(d): (q_i + v) . r_{i,j}  -> per-query matvec = multiply + lane reduce.
        bd_de = jnp.sum(q_v[:, sl][:, None, :] * rh[:, :, sl], axis=-1)  # (S, S)
        s = (ac_ce + bd_de) * scale
        m = jnp.max(s, axis=-1, keepdims=True)
        p = jnp.exp(s - m)
        w = p / jnp.sum(p, axis=-1, keepdims=True)
        w_ref[0, h] = w.astype(w_ref.dtype)
        outs.append(jnp.dot(w, vh[:, sl],
                            precision=hi, preferred_element_type=f32))  # (S, Dh)
    # Single full-width lane-dense store of this batch element's context slab.
    out_ref[0] = jnp.concatenate(outs, axis=-1).astype(out_ref.dtype)


def _linear(x, w, b):
    # torch.nn.Linear semantics: y = x @ W^T + b with W of shape (out, in).
    return jnp.matmul(x, w.T) + b


def mha_relpos_forward(q, k, v, r, params):
    """Forward pass of the module. Returns (attn_output, attn_weights)."""
    B, S, D = q.shape
    H, Dh = params["u"].shape
    assert H * Dh == D

    # Projections as XLA GEMMs (heads end up concatenated along the last/lane axis,
    # which is exactly reshape(B, S, H, Dh) in row-major order).
    q_h = _linear(q, params["Wq"], params["bq"])          # (B, S, D)
    k_h = _linear(k, params["Wk"], params["bk"])          # (B, S, D)
    v_h = _linear(v, params["Wv"], params["bv"])          # (B, S, D)
    r_h = _linear(r, params["Wr"], params["br"])          # (S, S, D)
    u_flat = params["u"].reshape(1, D)
    v_flat = params["v"].reshape(1, D)

    kernel = functools.partial(_rel_attn_kernel, n_head=H, d_head=Dh)
    ctx, attn_w = pl.pallas_call(
        kernel,
        out_shape=(jax.ShapeDtypeStruct((B, S, D), q.dtype),
                   jax.ShapeDtypeStruct((B, H, S, S), jnp.float32)),
        grid_spec=pltpu.PrefetchScalarGridSpec(
            num_scalar_prefetch=0,
            grid=(B,),
            in_specs=[
                pl.BlockSpec((1, S, D), lambda b: (b, 0, 0)),
                pl.BlockSpec((1, S, D), lambda b: (b, 0, 0)),
                pl.BlockSpec((1, S, D), lambda b: (b, 0, 0)),
                pl.BlockSpec((S, S, D), lambda b: (0, 0, 0)),   # resident across grid
                pl.BlockSpec((1, D), lambda b: (0, 0)),
                pl.BlockSpec((1, D), lambda b: (0, 0)),
            ],
            out_specs=[
                pl.BlockSpec((1, S, D), lambda b: (b, 0, 0)),
                pl.BlockSpec((1, H, S, S), lambda b: (b, 0, 0, 0)),
            ],
        ),
        compiler_params=pltpu.CompilerParams(dimension_semantics=("parallel",)),
    )(q_h, k_h, v_h, r_h, u_flat, v_flat)

    attn_out = _linear(ctx, params["Wo"], params["bo"])   # o_proj
    # Dropout: eval-mode identity.
    return attn_out, attn_w


def mha_relpos_reference(q, k, v, r, params):
    """Pure-JAX reference (intended Transformer-XL semantics of the module)."""
    B, S, D = q.shape
    H, Dh = params["u"].shape
    hi = "highest"
    q_h = _linear(q, params["Wq"], params["bq"]).reshape(B, S, H, Dh).transpose(0, 2, 1, 3)
    k_h = _linear(k, params["Wk"], params["bk"]).reshape(B, S, H, Dh).transpose(0, 2, 1, 3)
    v_h = _linear(v, params["Wv"], params["bv"]).reshape(B, S, H, Dh).transpose(0, 2, 1, 3)
    r_h = _linear(r, params["Wr"], params["br"]).reshape(S, S, H, Dh).transpose(2, 0, 1, 3)
    ac = jnp.einsum("bhid,bhjd->bhij", q_h, k_h, precision=hi)
    bd = jnp.einsum("bhid,hijd->bhij", q_h, r_h, precision=hi)
    ce = jnp.einsum("hd,bhjd->bhj", params["u"], k_h, precision=hi)[:, :, None, :]
    de = jnp.einsum("hd,hijd->hij", params["v"], r_h, precision=hi)[None]
    scores = (ac + bd + ce + de) / math.sqrt(Dh)
    w = jax.nn.softmax(scores, axis=-1)
    ctx = jnp.einsum("bhij,bhjd->bhid", w, v_h, precision=hi)
    ctx = ctx.transpose(0, 2, 1, 3).reshape(B, S, D)
    out = _linear(ctx, params["Wo"], params["bo"])
    return out, w


if __name__ == "__main__":
    B, S, D, H = 2, 8, 32, 4
    Dh = D // H

    key = jax.random.PRNGKey(0)
    ks = jax.random.split(key, 18)

    def xavier(k_, shape):
        fan_out, fan_in = shape[0], shape[-1]
        std = math.sqrt(2.0 / (fan_in + fan_out))
        return jax.random.normal(k_, shape, dtype=jnp.float32) * std

    params = {
        "Wq": xavier(ks[0], (D, D)), "bq": 0.02 * jax.random.normal(ks[1], (D,), jnp.float32),
        "Wk": xavier(ks[2], (D, D)), "bk": 0.02 * jax.random.normal(ks[3], (D,), jnp.float32),
        "Wv": xavier(ks[4], (D, D)), "bv": 0.02 * jax.random.normal(ks[5], (D,), jnp.float32),
        "Wr": xavier(ks[6], (D, D)), "br": 0.02 * jax.random.normal(ks[7], (D,), jnp.float32),
        "Wo": xavier(ks[8], (D, D)), "bo": 0.02 * jax.random.normal(ks[9], (D,), jnp.float32),
        "u": xavier(ks[10], (H, Dh)),
        "v": xavier(ks[11], (H, Dh)),
    }

    q = jax.random.normal(ks[12], (B, S, D), jnp.float32)
    k = jax.random.normal(ks[13], (B, S, D), jnp.float32)
    v = jax.random.normal(ks[14], (B, S, D), jnp.float32)
    r = jax.random.normal(ks[15], (S, S, D), jnp.float32)   # relative pos encodings

    out, w = mha_relpos_forward(q, k, v, r, params)
    out = jax.block_until_ready(out)
    w = jax.block_until_ready(w)

    ref_out, ref_w = mha_relpos_reference(q, k, v, r, params)

    assert out.shape == (B, S, D) and out.dtype == q.dtype
    assert w.shape == (B, H, S, S)
    assert jnp.allclose(w, ref_w, atol=1e-4, rtol=1e-4), float(jnp.max(jnp.abs(w - ref_w)))
    assert jnp.allclose(out, ref_out, atol=1e-4, rtol=1e-4), float(jnp.max(jnp.abs(out - ref_out)))

    print("KERNEL_OK")
</pallas_src>

<mosaic_0001>
module attributes {stable_mosaic.version = 11 : i64} {
  func.func @_rel_attn_kernel(%arg0: i32, %arg1: memref<1x8x32xf32, #tpu.memory_space<vmem>>, %arg2: memref<1x8x32xf32, #tpu.memory_space<vmem>>, %arg3: memref<1x8x32xf32, #tpu.memory_space<vmem>>, %arg4: memref<8x8x32xf32, #tpu.memory_space<vmem>>, %arg5: memref<1x32xf32, #tpu.memory_space<vmem>>, %arg6: memref<1x32xf32, #tpu.memory_space<vmem>>, %arg7: memref<1x8x32xf32, #tpu.memory_space<vmem>>, %arg8: memref<1x4x8x8xf32, #tpu.memory_space<vmem>>) attributes {dimension_semantics = [#tpu.dimension_semantics<parallel>], iteration_bounds = array<i64: 2>, scalar_prefetch = 0 : i64, scratch_operands = 0 : i64, tpu.core_type = #tpu.core_type<tc>, window_params = [{transform_indices = @transform_0, window_bounds = array<i64: 1, 8, 32>}, {transform_indices = @transform_1, window_bounds = array<i64: 1, 8, 32>}, {transform_indices = @transform_2, window_bounds = array<i64: 1, 8, 32>}, {pipeline_mode = #tpu.pipeline_mode<synchronous>, transform_indices = @transform_3, window_bounds = array<i64: 8, 8, 32>}, {pipeline_mode = #tpu.pipeline_mode<synchronous>, transform_indices = @transform_4, window_bounds = array<i64: 1, 32>}, {pipeline_mode = #tpu.pipeline_mode<synchronous>, transform_indices = @transform_5, window_bounds = array<i64: 1, 32>}, {transform_indices = @transform_6, window_bounds = array<i64: 1, 8, 32>}, {transform_indices = @transform_7, window_bounds = array<i64: 1, 4, 8, 8>}]} {
    %c0 = arith.constant 0 : index
    %c0_0 = arith.constant 0 : index
    %c0_1 = arith.constant 0 : index
    %0 = vector.load %arg1[%c0, %c0_0, %c0_1] : memref<1x8x32xf32, #tpu.memory_space<vmem>>, vector<1x8x32xf32>
    %1 = vector.shape_cast %0 : vector<1x8x32xf32> to vector<8x32xf32>
    %c0_2 = arith.constant 0 : index
    %c0_3 = arith.constant 0 : index
    %c0_4 = arith.constant 0 : index
    %2 = vector.load %arg2[%c0_2, %c0_3, %c0_4] : memref<1x8x32xf32, #tpu.memory_space<vmem>>, vector<1x8x32xf32>
    %3 = vector.shape_cast %2 : vector<1x8x32xf32> to vector<8x32xf32>
    %c0_5 = arith.constant 0 : index
    %c0_6 = arith.constant 0 : index
    %c0_7 = arith.constant 0 : index
    %4 = vector.load %arg3[%c0_5, %c0_6, %c0_7] : memref<1x8x32xf32, #tpu.memory_space<vmem>>, vector<1x8x32xf32>
    %5 = vector.shape_cast %4 : vector<1x8x32xf32> to vector<8x32xf32>
    %c0_8 = arith.constant 0 : index
    %c0_9 = arith.constant 0 : index
    %c0_10 = arith.constant 0 : index
    %6 = vector.load %arg4[%c0_8, %c0_9, %c0_10] : memref<8x8x32xf32, #tpu.memory_space<vmem>>, vector<8x8x32xf32>
    %c0_11 = arith.constant 0 : index
    %c0_12 = arith.constant 0 : index
    %7 = vector.load %arg5[%c0_11, %c0_12] : memref<1x32xf32, #tpu.memory_space<vmem>>, vector<1x32xf32>
    %8 = vector.broadcast %7 : vector<1x32xf32> to vector<8x32xf32>
    %9 = arith.addf %1, %8 : vector<8x32xf32>
    %c0_13 = arith.constant 0 : index
    %c0_14 = arith.constant 0 : index
    %10 = vector.load %arg6[%c0_13, %c0_14] : memref<1x32xf32, #tpu.memory_space<vmem>>, vector<1x32xf32>
    %11 = vector.broadcast %10 : vector<1x32xf32> to vector<8x32xf32>
    %12 = arith.addf %1, %11 : vector<8x32xf32>
    %13 = vector.extract_strided_slice %9 {offsets = [0, 0], sizes = [8, 8], strides = [1, 1]} : vector<8x32xf32> to vector<8x8xf32>
    %14 = vector.extract_strided_slice %3 {offsets = [0, 0], sizes = [8, 8], strides = [1, 1]} : vector<8x32xf32> to vector<8x8xf32>
    %cst = arith.constant dense<0.000000e+00> : vector<8x8xf32>
    %15 = tpu.matmul %13, %14, %cst {dimension_numbers = #tpu.dot_dimension_numbers<[1], [1], [0], [0], [0, 0, 1, 0], [], []>, precision = #tpu.contract_precision<fp32>} : vector<8x8xf32>, vector<8x8xf32>, vector<8x8xf32> -> vector<8x8xf32>
    %16 = vector.extract_strided_slice %12 {offsets = [0, 0], sizes = [8, 8], strides = [1, 1]} : vector<8x32xf32> to vector<8x8xf32>
    %17 = vector.shape_cast %16 : vector<8x8xf32> to vector<8x1x8xf32>
    %18 = vector.extract_strided_slice %6 {offsets = [0, 0, 0], sizes = [8, 8, 8], strides = [1, 1, 1]} : vector<8x8x32xf32> to vector<8x8x8xf32>
    %19 = vector.broadcast %17 : vector<8x1x8xf32> to vector<8x8x8xf32>
    %20 = arith.mulf %19, %18 : vector<8x8x8xf32>
    %cst_15 = arith.constant dense<0.000000e+00> : vector<8x8xf32>
    %21 = vector.multi_reduction <add>, %20, %cst_15 [2] : vector<8x8x8xf32> to vector<8x8xf32>
    %22 = arith.addf %15, %21 : vector<8x8xf32>
    %cst_16 = arith.constant 0.353553385 : f32
    %23 = vector.broadcast %cst_16 : f32 to vector<8x8xf32>
    %24 = arith.mulf %22, %23 : vector<8x8xf32>
    %cst_17 = arith.constant dense<0xFF800000> : vector<8xf32>
    %25 = vector.multi_reduction <maximumf>, %24, %cst_17 [1] : vector<8x8xf32> to vector<8xf32>
    %26 = vector.shape_cast %25 : vector<8xf32> to vector<8x1xf32>
    %27 = vector.broadcast %26 : vector<8x1xf32> to vector<8x8xf32>
    %28 = arith.subf %24, %27 : vector<8x8xf32>
    %29 = math.exp %28 : vector<8x8xf32>
    %cst_18 = arith.constant dense<0.000000e+00> : vector<8xf32>
    %30 = vector.multi_reduction <add>, %29, %cst_18 [1] : vector<8x8xf32> to vector<8xf32>
    %31 = vector.shape_cast %30 : vector<8xf32> to vector<8x1xf32>
    %32 = vector.broadcast %31 : vector<8x1xf32> to vector<8x8xf32>
    %33 = arith.divf %29, %32 : vector<8x8xf32>
    %c0_19 = arith.constant 0 : index
    %c0_20 = arith.constant 0 : index
    %c0_21 = arith.constant 0 : index
    %c0_22 = arith.constant 0 : index
    %34 = vector.load %arg8[%c0_19, %c0_20, %c0_21, %c0_22] : memref<1x4x8x8xf32, #tpu.memory_space<vmem>>, vector<1x1x8x8xf32>
    %35 = vector.shape_cast %34 : vector<1x1x8x8xf32> to vector<8x8xf32>
    %36 = vector.shape_cast %33 : vector<8x8xf32> to vector<1x1x8x8xf32>
    tpu.vector_store %arg8[%c0_19, %c0_20, %c0_21, %c0_22], %36 {strides = array<i32>} : memref<1x4x8x8xf32, #tpu.memory_space<vmem>>, vector<1x1x8x8xf32>,
    %37 = vector.extract_strided_slice %5 {offsets = [0, 0], sizes = [8, 8], strides = [1, 1]} : vector<8x32xf32> to vector<8x8xf32>
    %cst_23 = arith.constant dense<0.000000e+00> : vector<8x8xf32>
    %38 = tpu.matmul %33, %37, %cst_23 {dimension_numbers = #tpu.dot_dimension_numbers<[1], [0], [0], [1], [0, 0, 1, 1], [], []>, precision = #tpu.contract_precision<fp32>} : vector<8x8xf32>, vector<8x8xf32>, vector<8x8xf32> -> vector<8x8xf32>
    %39 = vector.extract_strided_slice %9 {offsets = [0, 8], sizes = [8, 8], strides = [1, 1]} : vector<8x32xf32> to vector<8x8xf32>
    %40 = vector.extract_strided_slice %3 {offsets = [0, 8], sizes = [8, 8], strides = [1, 1]} : vector<8x32xf32> to vector<8x8xf32>
    %cst_24 = arith.constant dense<0.000000e+00> : vector<8x8xf32>
    %41 = tpu.matmul %39, %40, %cst_24 {dimension_numbers = #tpu.dot_dimension_numbers<[1], [1], [0], [0], [0, 0, 1, 0], [], []>, precision = #tpu.contract_precision<fp32>} : vector<8x8xf32>, vector<8x8xf32>, vector<8x8xf32> -> vector<8x8xf32>
    %42 = vector.extract_strided_slice %12 {offsets = [0, 8], sizes = [8, 8], strides = [1, 1]} : vector<8x32xf32> to vector<8x8xf32>
    %43 = vector.shape_cast %42 : vector<8x8xf32> to vector<8x1x8xf32>
    %44 = vector.extract_strided_slice %6 {offsets = [0, 0, 8], sizes = [8, 8, 8], strides = [1, 1, 1]} : vector<8x8x32xf32> to vector<8x8x8xf32>
    %45 = vector.broadcast %43 : vector<8x1x8xf32> to vector<8x8x8xf32>
    %46 = arith.mulf %45, %44 : vector<8x8x8xf32>
    %cst_25 = arith.constant dense<0.000000e+00> : vector<8x8xf32>
    %47 = vector.multi_reduction <add>, %46, %cst_25 [2] : vector<8x8x8xf32> to vector<8x8xf32>
    %48 = arith.addf %41, %47 : vector<8x8xf32>
    %cst_26 = arith.constant 0.353553385 : f32
    %49 = vector.broadcast %cst_26 : f32 to vector<8x8xf32>
    %50 = arith.mulf %48, %49 : vector<8x8xf32>
    %cst_27 = arith.constant dense<0xFF800000> : vector<8xf32>
    %51 = vector.multi_reduction <maximumf>, %50, %cst_27 [1] : vector<8x8xf32> to vector<8xf32>
    %52 = vector.shape_cast %51 : vector<8xf32> to vector<8x1xf32>
    %53 = vector.broadcast %52 : vector<8x1xf32> to vector<8x8xf32>
    %54 = arith.subf %50, %53 : vector<8x8xf32>
    %55 = math.exp %54 : vector<8x8xf32>
    %cst_28 = arith.constant dense<0.000000e+00> : vector<8xf32>
    %56 = vector.multi_reduction <add>, %55, %cst_28 [1] : vector<8x8xf32> to vector<8xf32>
    %57 = vector.shape_cast %56 : vector<8xf32> to vector<8x1xf32>
    %58 = vector.broadcast %57 : vector<8x1xf32> to vector<8x8xf32>
    %59 = arith.divf %55, %58 : vector<8x8xf32>
    %c0_29 = arith.constant 0 : index
    %c1 = arith.constant 1 : index
    %c0_30 = arith.constant 0 : index
    %c0_31 = arith.constant 0 : index
    %60 = vector.load %arg8[%c0_29, %c1, %c0_30, %c0_31] : memref<1x4x8x8xf32, #tpu.memory_space<vmem>>, vector<1x1x8x8xf32>
    %61 = vector.shape_cast %60 : vector<1x1x8x8xf32> to vector<8x8xf32>
    %62 = vector.shape_cast %59 : vector<8x8xf32> to vector<1x1x8x8xf32>
    tpu.vector_store %arg8[%c0_29, %c1, %c0_30, %c0_31], %62 {strides = array<i32>} : memref<1x4x8x8xf32, #tpu.memory_space<vmem>>, vector<1x1x8x8xf32>,
    %63 = vector.extract_strided_slice %5 {offsets = [0, 8], sizes = [8, 8], strides = [1, 1]} : vector<8x32xf32> to vector<8x8xf32>
    %cst_32 = arith.constant dense<0.000000e+00> : vector<8x8xf32>
    %64 = tpu.matmul %59, %63, %cst_32 {dimension_numbers = #tpu.dot_dimension_numbers<[1], [0], [0], [1], [0, 0, 1, 1], [], []>, precision = #tpu.contract_precision<fp32>} : vector<8x8xf32>, vector<8x8xf32>, vector<8x8xf32> -> vector<8x8xf32>
    %65 = vector.extract_strided_slice %9 {offsets = [0, 16], sizes = [8, 8], strides = [1, 1]} : vector<8x32xf32> to vector<8x8xf32>
    %66 = vector.extract_strided_slice %3 {offsets = [0, 16], sizes = [8, 8], strides = [1, 1]} : vector<8x32xf32> to vector<8x8xf32>
    %cst_33 = arith.constant dense<0.000000e+00> : vector<8x8xf32>
    %67 = tpu.matmul %65, %66, %cst_33 {dimension_numbers = #tpu.dot_dimension_numbers<[1], [1], [0], [0], [0, 0, 1, 0], [], []>, precision = #tpu.contract_precision<fp32>} : vector<8x8xf32>, vector<8x8xf32>, vector<8x8xf32> -> vector<8x8xf32>
    %68 = vector.extract_strided_slice %12 {offsets = [0, 16], sizes = [8, 8], strides = [1, 1]} : vector<8x32xf32> to vector<8x8xf32>
    %69 = vector.shape_cast %68 : vector<8x8xf32> to vector<8x1x8xf32>
    %70 = vector.extract_strided_slice %6 {offsets = [0, 0, 16], sizes = [8, 8, 8], strides = [1, 1, 1]} : vector<8x8x32xf32> to vector<8x8x8xf32>
    %71 = vector.broadcast %69 : vector<8x1x8xf32> to vector<8x8x8xf32>
    %72 = arith.mulf %71, %70 : vector<8x8x8xf32>
    %cst_34 = arith.constant dense<0.000000e+00> : vector<8x8xf32>
    %73 = vector.multi_reduction <add>, %72, %cst_34 [2] : vector<8x8x8xf32> to vector<8x8xf32>
    %74 = arith.addf %67, %73 : vector<8x8xf32>
    %cst_35 = arith.constant 0.353553385 : f32
    %75 = vector.broadcast %cst_35 : f32 to vector<8x8xf32>
    %76 = arith.mulf %74, %75 : vector<8x8xf32>
    %cst_36 = arith.constant dense<0xFF800000> : vector<8xf32>
    %77 = vector.multi_reduction <maximumf>, %76, %cst_36 [1] : vector<8x8xf32> to vector<8xf32>
    %78 = vector.shape_cast %77 : vector<8xf32> to vector<8x1xf32>
    %79 = vector.broadcast %78 : vector<8x1xf32> to vector<8x8xf32>
    %80 = arith.subf %76, %79 : vector<8x8xf32>
    %81 = math.exp %80 : vector<8x8xf32>
    %cst_37 = arith.constant dense<0.000000e+00> : vector<8xf32>
    %82 = vector.multi_reduction <add>, %81, %cst_37 [1] : vector<8x8xf32> to vector<8xf32>
    %83 = vector.shape_cast %82 : vector<8xf32> to vector<8x1xf32>
    %84 = vector.broadcast %83 : vector<8x1xf32> to vector<8x8xf32>
    %85 = arith.divf %81, %84 : vector<8x8xf32>
    %c0_38 = arith.constant 0 : index
    %c2 = arith.constant 2 : index
    %c0_39 = arith.constant 0 : index
    %c0_40 = arith.constant 0 : index
    %86 = vector.load %arg8[%c0_38, %c2, %c0_39, %c0_40] : memref<1x4x8x8xf32, #tpu.memory_space<vmem>>, vector<1x1x8x8xf32>
    %87 = vector.shape_cast %86 : vector<1x1x8x8xf32> to vector<8x8xf32>
    %88 = vector.shape_cast %85 : vector<8x8xf32> to vector<1x1x8x8xf32>
    tpu.vector_store %arg8[%c0_38, %c2, %c0_39, %c0_40], %88 {strides = array<i32>} : memref<1x4x8x8xf32, #tpu.memory_space<vmem>>, vector<1x1x8x8xf32>,
    %89 = vector.extract_strided_slice %5 {offsets = [0, 16], sizes = [8, 8], strides = [1, 1]} : vector<8x32xf32> to vector<8x8xf32>
    %cst_41 = arith.constant dense<0.000000e+00> : vector<8x8xf32>
    %90 = tpu.matmul %85, %89, %cst_41 {dimension_numbers = #tpu.dot_dimension_numbers<[1], [0], [0], [1], [0, 0, 1, 1], [], []>, precision = #tpu.contract_precision<fp32>} : vector<8x8xf32>, vector<8x8xf32>, vector<8x8xf32> -> vector<8x8xf32>
    %91 = vector.extract_strided_slice %9 {offsets = [0, 24], sizes = [8, 8], strides = [1, 1]} : vector<8x32xf32> to vector<8x8xf32>
    %92 = vector.extract_strided_slice %3 {offsets = [0, 24], sizes = [8, 8], strides = [1, 1]} : vector<8x32xf32> to vector<8x8xf32>
    %cst_42 = arith.constant dense<0.000000e+00> : vector<8x8xf32>
    %93 = tpu.matmul %91, %92, %cst_42 {dimension_numbers = #tpu.dot_dimension_numbers<[1], [1], [0], [0], [0, 0, 1, 0], [], []>, precision = #tpu.contract_precision<fp32>} : vector<8x8xf32>, vector<8x8xf32>, vector<8x8xf32> -> vector<8x8xf32>
    %94 = vector.extract_strided_slice %12 {offsets = [0, 24], sizes = [8, 8], strides = [1, 1]} : vector<8x32xf32> to vector<8x8xf32>
    %95 = vector.shape_cast %94 : vector<8x8xf32> to vector<8x1x8xf32>
    %96 = vector.extract_strided_slice %6 {offsets = [0, 0, 24], sizes = [8, 8, 8], strides = [1, 1, 1]} : vector<8x8x32xf32> to vector<8x8x8xf32>
    %97 = vector.broadcast %95 : vector<8x1x8xf32> to vector<8x8x8xf32>
    %98 = arith.mulf %97, %96 : vector<8x8x8xf32>
    %cst_43 = arith.constant dense<0.000000e+00> : vector<8x8xf32>
    %99 = vector.multi_reduction <add>, %98, %cst_43 [2] : vector<8x8x8xf32> to vector<8x8xf32>
    %100 = arith.addf %93, %99 : vector<8x8xf32>
    %cst_44 = arith.constant 0.353553385 : f32
    %101 = vector.broadcast %cst_44 : f32 to vector<8x8xf32>
    %102 = arith.mulf %100, %101 : vector<8x8xf32>
    %cst_45 = arith.constant dense<0xFF800000> : vector<8xf32>
    %103 = vector.multi_reduction <maximumf>, %102, %cst_45 [1] : vector<8x8xf32> to vector<8xf32>
    %104 = vector.shape_cast %103 : vector<8xf32> to vector<8x1xf32>
    %105 = vector.broadcast %104 : vector<8x1xf32> to vector<8x8xf32>
    %106 = arith.subf %102, %105 : vector<8x8xf32>
    %107 = math.exp %106 : vector<8x8xf32>
    %cst_46 = arith.constant dense<0.000000e+00> : vector<8xf32>
    %108 = vector.multi_reduction <add>, %107, %cst_46 [1] : vector<8x8xf32> to vector<8xf32>
    %109 = vector.shape_cast %108 : vector<8xf32> to vector<8x1xf32>
    %110 = vector.broadcast %109 : vector<8x1xf32> to vector<8x8xf32>
    %111 = arith.divf %107, %110 : vector<8x8xf32>
    %c0_47 = arith.constant 0 : index
    %c3 = arith.constant 3 : index
    %c0_48 = arith.constant 0 : index
    %c0_49 = arith.constant 0 : index
    %112 = vector.load %arg8[%c0_47, %c3, %c0_48, %c0_49] : memref<1x4x8x8xf32, #tpu.memory_space<vmem>>, vector<1x1x8x8xf32>
    %113 = vector.shape_cast %112 : vector<1x1x8x8xf32> to vector<8x8xf32>
    %114 = vector.shape_cast %111 : vector<8x8xf32> to vector<1x1x8x8xf32>
    tpu.vector_store %arg8[%c0_47, %c3, %c0_48, %c0_49], %114 {strides = array<i32>} : memref<1x4x8x8xf32, #tpu.memory_space<vmem>>, vector<1x1x8x8xf32>,
    %115 = vector.extract_strided_slice %5 {offsets = [0, 24], sizes = [8, 8], strides = [1, 1]} : vector<8x32xf32> to vector<8x8xf32>
    %cst_50 = arith.constant dense<0.000000e+00> : vector<8x8xf32>
    %116 = tpu.matmul %111, %115, %cst_50 {dimension_numbers = #tpu.dot_dimension_numbers<[1], [0], [0], [1], [0, 0, 1, 1], [], []>, precision = #tpu.contract_precision<fp32>} : vector<8x8xf32>, vector<8x8xf32>, vector<8x8xf32> -> vector<8x8xf32>
    %117 = tpu.concatenate %38, %64, %90, %116 in 1 : vector<8x8xf32>, vector<8x8xf32>, vector<8x8xf32>, vector<8x8xf32> -> vector<8x32xf32>
    %c0_51 = arith.constant 0 : index
    %c0_52 = arith.constant 0 : index
    %c0_53 = arith.constant 0 : index
    %118 = vector.load %arg7[%c0_51, %c0_52, %c0_53] : memref<1x8x32xf32, #tpu.memory_space<vmem>>, vector<1x8x32xf32>
    %119 = vector.shape_cast %118 : vector<1x8x32xf32> to vector<8x32xf32>
    %120 = vector.shape_cast %117 : vector<8x32xf32> to vector<1x8x32xf32>
    tpu.vector_store %arg7[%c0_51, %c0_52, %c0_53], %120 {strides = array<i32>} : memref<1x8x32xf32, #tpu.memory_space<vmem>>, vector<1x8x32xf32>,
    return
  }
  func.func @transform_0(%arg0: i32) -> (i32, i32, i32) {
    %c0_i32 = arith.constant 0 : i32
    %c0_i32_0 = arith.constant 0 : i32
    %c0_i32_1 = arith.constant 0 : i32
    return %arg0, %c0_i32, %c0_i32_0 : i32, i32, i32
  }
  func.func @transform_1(%arg0: i32) -> (i32, i32, i32) {
    %c0_i32 = arith.constant 0 : i32
    %c0_i32_0 = arith.constant 0 : i32
    %c0_i32_1 = arith.constant 0 : i32
    return %arg0, %c0_i32, %c0_i32_0 : i32, i32, i32
  }
  func.func @transform_2(%arg0: i32) -> (i32, i32, i32) {
    %c0_i32 = arith.constant 0 : i32
    %c0_i32_0 = arith.constant 0 : i32
    %c0_i32_1 = arith.constant 0 : i32
    return %arg0, %c0_i32, %c0_i32_0 : i32, i32, i32
  }
  func.func @transform_3(%arg0: i32) -> (i32, i32, i32) {
    %c0_i32 = arith.constant 0 : i32
    %c0_i32_0 = arith.constant 0 : i32
    %c0_i32_1 = arith.constant 0 : i32
    %c0_i32_2 = arith.constant 0 : i32
    return %c0_i32, %c0_i32_0, %c0_i32_1 : i32, i32, i32
  }
  func.func @transform_4(%arg0: i32) -> (i32, i32) {
    %c0_i32 = arith.constant 0 : i32
    %c0_i32_0 = arith.constant 0 : i32
    %c0_i32_1 = arith.constant 0 : i32
    return %c0_i32, %c0_i32_0 : i32, i32
  }
  func.func @transform_5(%arg0: i32) -> (i32, i32) {
    %c0_i32 = arith.constant 0 : i32
    %c0_i32_0 = arith.constant 0 : i32
    %c0_i32_1 = arith.constant 0 : i32
    return %c0_i32, %c0_i32_0 : i32, i32
  }
  func.func @transform_6(%arg0: i32) -> (i32, i32, i32) {
    %c0_i32 = arith.constant 0 : i32
    %c0_i32_0 = arith.constant 0 : i32
    %c0_i32_1 = arith.constant 0 : i32
    return %arg0, %c0_i32, %c0_i32_0 : i32, i32, i32
  }
  func.func @transform_7(%arg0: i32) -> (i32, i32, i32, i32) {
    %c0_i32 = arith.constant 0 : i32
    %c0_i32_0 = arith.constant 0 : i32
    %c0_i32_1 = arith.constant 0 : i32
    %c0_i32_2 = arith.constant 0 : i32
    return %arg0, %c0_i32, %c0_i32_0, %c0_i32_1 : i32, i32, i32, i32
  }
}

</mosaic_0001>

<bundles_post_ra>
// kernel: tpu_custom_call.1
= control target key start
LH: loop header
LB: loop body
LE: loop exit
PB: predicated region body
PF: predicated region fallthrough
CT: control target
= control target key end

     0   :  { %s3160_s0 = inlined_call_operand.hbm [shape: f32[2,8,32], index: 0, kind: input, shape index: {}]   ;;  %s3161_s1 = inlined_call_operand.hbm [shape: f32[2,8,32], index: 1, kind: input, shape index: {}]   ;;  %s3162_s2 = inlined_call_operand.hbm [shape: f32[2,8,32], index: 2, kind: input, shape index: {}]   ;;  %s3163_s3 = inlined_call_operand.hbm [shape: f32[8,8,32], index: 3, kind: input, shape index: {}]   ;;  %s3164_s4 = inlined_call_operand.vmem [shape: f32[1,32], index: 4, kind: input, shape index: {}]   ;;  %s3165_s5 = inlined_call_operand.vmem [shape: f32[1,32], index: 5, kind: input, shape index: {}]   ;;  %s3166_s6 = inlined_call_operand.hbm [shape: f32[2,8,32], index: 6, kind: output, shape index: {0}]   ;;  %s3167_s7 = inlined_call_operand.hbm [shape: f32[2,4,8,8], index: 7, kind: output, shape index: {1}]  }
   0x1   :  { %3174 = sst [smem:[#allocation23_spill]] %s3161_s1 }
   0x2   :  { %3175 = sst [smem:[#allocation24_spill]] %s3163_s3 }
   0x3   :  { %13 = vsyncpa [#allocation3], 0 }
   0x4   :  { %15 = vsyncpa [#allocation3 + $0x1], 0 }
   0x5   :  { %16 = vsyncpa [#allocation6], 0 }
   0x6   :  { %18 = vsyncpa [#allocation6 + $0x1], 0 }
   0x7   :  { %19 = vsyncpa [#allocation9], 0 }
   0x8   :  { %20 = vsyncpa [#allocation4], 0 }
   0x9   :  { %22 = vsyncpa [#allocation4 + $0x1], 0 }
   0xa   :  { %23 = vsyncpa [#allocation12], 0 }
   0xb   :  { %25 = vsyncpa [#allocation12 + $0x1], 0  ;;  %s2679_s24 = smov 0   ;;  %s2681_s25 = smov 0  }
   0xc   :  { %s2683_s26 = smov 0   ;;  %s2685_s27 = smov 0  }
   0xd LB: > { %3176 = sst [smem:[#allocation18_spill]] %s2615_s24  ;;  %s2700_s28 = sadd.s32 4294967295, %s2627_s27   ;;  %s2627_s27 = sphi %s2685_s27, %s3193_s27   ;;  %s2623_s26 = sphi %s2683_s26, %s3197_s26   ;;  %s2619_s25 = sphi %s2681_s25, %s3196_s25   ;;  %s2615_s24 = sphi %s2679_s24, %s3195_s24  }
   0xe   : > { %3177 = sst [smem:[#allocation19_spill]] %s2627_s27  ;;  %s2274_s29 = sadd.s32 4294967294, %s2627_s27  }
   0xf   : > { %s2704_s30 = sadd.s32 1, %s2627_s27   ;;  %s38_s8 = sadd.s32 1, %s2623_s26 }
  0x10   : > { %3178 = sst [smem:[#allocation20_spill]] %s2704_s30  ;;  %s35_s9 = ssub.s32 %s2627_s27, %s2704_s30 }
  0x11   : > { %p45_p0 = scmp.ne.s32.totalorder %s2623_s26, %s2619_s25  ;;  %p36_p1 = scmp.eq.s32.totalorder %s35_s9, 0 }
  0x12   : > { %p46_p2 = scmp.eq.s32.totalorder %s2627_s27, 0  ;;  %p51_p3 = scmp.ne.s32.totalorder %s2619_s25, %s2615_s24 }
  0x13   : > { %p190_p4 = scmp.eq.s32.totalorder %s2700_s28, 1  ;;  %p196_p7 = scmp.eq.s32.totalorder %s2274_s29, 1 }
  0x14   : > { %s2716_s10 = scalar_select %p36_p1, %s2623_s26, %s38_s8  }
  0x15   : > { %p47_p5 = por %p46_p2, %p45_p0  ;;  %p2718_p6 = por %p190_p4, %p45_p0 }
  0x16   : > { %3179 = sst [smem:[#allocation21_spill]] %s2716_s10  ;;  %p2338_p9 = scmp.lt.s32.totalorder %s2627_s27, 2 }
  0x17   : > { %p2727_p10 = por %p196_p7, %p51_p3  ;;  %s3168_s13 = sand.u32 1, %s2623_s26  }
  0x18   : > { %s2734_s14 = sshll.u32 %s3168_s13, 3  ;;  %s2737_s15 = sshll.u32 %s2627_s27, 3 }
  0x19   : > { %s3181_s12 = scalar_select %p2727_p10, 1, 0 }
  0x1a   : > { %p2739_p11 = pnand %p2338_p9, %p47_p5  ;;  %s281_s17 = sand.u32 1, %s2627_s27  }
  0x1b   : > { %3182 = sst [smem:[#allocation22_spill]] %s3181_s12  ;;  %s285_s22 = scalar_lea.vmem [#allocation5], %s2734_s14 }
  0x1c   : > { %s3184_s1 = sld [smem:[#allocation23_spill]]  ;;  %s293_s23 = sshll.u32 %s285_s22, 4  ;;  %s294_s23 = int_to_ptr.vmem [resolvable:$true] %s293_s23 }
  0x1d   : > { %s2749_s29 = scalar_lea.sflag [#allocation6], %s281_s17  ;;  %p2405_p13 = pneg %p2739_p11 }
  0x22   : > { %s289_s20 = scalar_lea.hbm %s3184_s1, %s2737_s15  ;;  %s2408_s19 = scalar_lea.hbm %s3184_s1, 16 }
  0x23   : > { %s291_s21 = sshll.u32 %s289_s20, 4  ;;  %s292_s21 = int_to_ptr.hbm [resolvable:$true] %s291_s21 }
  0x24   : > { %s2401_s8 = sshra.s32 %s292_s21, 4  ;;  %s2402_s8 = int_to_ptr.hbm [resolvable:$true] %s2401_s8 }
  0x25   : > { %s2403_s9 = scalar_lea.hbm %s2402_s8, 8  ;;  %p2409_p2 = scmp.lt.s32.totalorder %s2402_s8, %s3184_s1 }
  0x26   : > { %p2404_p12 = scmp.ne.s32.totalorder %s2402_s8, %s2403_s9  ;;  %p2410_p4 = scmp.lt.s32.totalorder %s2408_s19, %s2403_s9 }
  0x28   : > { %p2406_p0 = pnand %p2405_p13, %p2404_p12  ;;  %p2411_p5 = por %p2410_p4, %p2409_p2 }
  0x2a   : > { %p2407_p1 = pneg %p2406_p0 }
  0x2c   : > { %p2412_p7 = pnand %p2411_p5, %p2407_p1 }
  0x2e   : > { %2415 = shalt.err (!%p2412_p7)
}
  0x2f   : > { %2326 = dma.hbm_to_vmem [thread:$0]  (!%p2739_p11), %s292_s21, 128, %s294_s23, %s2749_s29  }
  0x30   : > { %p52_p9 = scmp.eq.s32.totalorder %s2700_s28, 0  ;;  %p2275_p12 = scmp.ge.s32.totalorder %s2627_s27, 1 }
  0x31   : > { %p229_p0 = scmp.lt.s32.totalorder %s2627_s27, 3  ;;  %s3185_s3 = sld [smem:[#allocation24_spill]] }
  0x32   : > { %p2776_p1 = por %p52_p9, %p51_p3  ;;  %s2629_s21 = smov [#allocation8]  }
  0x33   : > { %p2780_p2 = pnand %p2275_p12, %p229_p0  ;;  %s242_s23 = sshll.u32 %s2629_s21, 4  ;;  %s243_s23 = int_to_ptr.vmem [resolvable:$true] %s242_s23 }
  0x34   : > { %s270_s22 = scalar_lea.hbm %s3160_s0, %s2737_s15  ;;  %s266_s13 = scalar_lea.vmem [#allocation2], %s2734_s14 }
  0x35   : > { %p2316_p4 = pneg %p2780_p2  ;;  %s274_s17 = sshll.u32 %s266_s13, 4  ;;  %s275_s17 = int_to_ptr.vmem [resolvable:$true] %s274_s17 }
  0x36   : > { %s272_s1 = sshll.u32 %s270_s22, 4  ;;  %s2631_s10 = smov 8   ;;  %s273_s1 = int_to_ptr.hbm [resolvable:$true] %s272_s1 }
  0x37   : > { %s240_s8 = sshll.u32 %s3185_s3, 4  ;;  %p2317_p5 = pnand %p2316_p4, %p52_p9  ;;  %s241_s8 = int_to_ptr.hbm [resolvable:$true] %s240_s8 }
  0x38   : > { %s2630_s3 = smov 128   ;;  %s3188_s30 = sand.u32 1, %s2623_s26  }
  0x39   : > { %2319 = dma.hbm_to_vmem [thread:$0]  (!%p2317_p5), %s241_s8, 1024, %s243_s23, [#allocation9], %s2630_s3, %s2630_s3, %s2631_s10  }
  0x3a   : > { %s263_s21 = scalar_lea.sflag [#allocation3], %s3188_s30  ;;  %s2461_s27 = sshra.s32 %s273_s1, 4  ;;  %s2462_s27 = int_to_ptr.hbm [resolvable:$true] %s2461_s27 }
  0x3b   : > { %s2463_s12 = scalar_lea.hbm %s2462_s27, 8  ;;  %s2468_s13 = scalar_lea.hbm %s3160_s0, 16 }
  0x3c   : > { %p2464_p3 = scmp.ne.s32.totalorder %s2462_s27, %s2463_s12  ;;  %p2469_p0 = scmp.lt.s32.totalorder %s2462_s27, %s3160_s0 }
  0x3d   : > { %p2470_p4 = scmp.lt.s32.totalorder %s2468_s13, %s2463_s12 }
  0x3e   : > { %p2466_p7 = pnand %p2464_p3, %p2405_p13 }
  0x3f   : > { %p2471_p5 = por %p2470_p4, %p2469_p0 }
  0x40   : > { %p2467_p12 = pneg %p2466_p7 }
  0x42   : > { %p2472_p8 = pnand %p2471_p5, %p2467_p12 }
  0x44   : > { %2475 = shalt.err (!%p2472_p8)
}
  0x45   : > { %2323 = dma.hbm_to_vmem [thread:$0]  (!%p2739_p11), %s273_s1, 128, %s275_s17, %s263_s21  }
  0x46   : > { %s308_s10 = scalar_lea.hbm %s3162_s2, %s2737_s15  ;;  %s304_s23 = scalar_lea.vmem [#allocation7], %s2734_s14 }
  0x47   : > { %s310_s8 = sshll.u32 %s308_s10, 4  ;;  %s312_s19 = sshll.u32 %s304_s23, 4  ;;  %s311_s8 = int_to_ptr.hbm [resolvable:$true] %s310_s8  ;;  %s313_s19 = int_to_ptr.vmem [resolvable:$true] %s312_s19 }
  0x48   : > { %s2491_s24 = sshra.s32 %s311_s8, 4  ;;  %s2498_s1 = scalar_lea.hbm %s3162_s2, 16  ;;  %s2492_s24 = int_to_ptr.hbm [resolvable:$true] %s2491_s24 }
  0x49   : > { %s2493_s27 = scalar_lea.hbm %s2492_s24, 8  ;;  %p2499_p12 = scmp.lt.s32.totalorder %s2492_s24, %s3162_s2 }
  0x4a   : > { %p2494_p3 = scmp.ne.s32.totalorder %s2492_s24, %s2493_s27  ;;  %p2500_p0 = scmp.lt.s32.totalorder %s2498_s1, %s2493_s27 }
  0x4c   : > { %p2496_p8 = pnand %p2494_p3, %p2405_p13  ;;  %p2501_p4 = por %p2500_p0, %p2499_p12 }
  0x4e   : > { %p2497_p7 = pneg %p2496_p8 }
  0x50   : > { %p2502_p5 = pnand %p2501_p4, %p2497_p7 }
  0x52   : > { %2505 = shalt.err (!%p2502_p5)
}
  0x53   : > { %2329 = dma.hbm_to_vmem [thread:$0]  (!%p2739_p11), %s311_s8, 128, %s313_s19, %s2749_s29  }
  0x54   : > { %321 = sbr.rel (%p2780_p2) target bundleno = 2092 (0x82c), region = 44  ;;  %s2826_s14 = sand.u32 (!%p2780_p2), 1, %s2619_s25  }
  0x55   : > { %s2829_s15 = sshll.u32 (!%p2780_p2), %s2826_s14, 3  ;;  %s324_s13 = scalar_lea.sflag (!%p2780_p2), [#allocation3], %s2826_s14 }
  0x56   : > { %s327_s22 = scalar_lea.vmem (!%p2780_p2), [#allocation2], %s2829_s15 }
  0x59   : > { %2594 = dma.done.wait (%p2776_p1), %s324_s13, 128  }
  0x5a   : > { %2596 = vsyncadd (%p2776_p1), %s324_s13, 4294967168  ;;  %s333_s16 = sand.u32 1, %s2700_s28   ;;  %s337_s18 = scalar_lea.vmem [#allocation5], %s2829_s15 }
  0x5b   : > { %s334_s29 = scalar_lea.sflag [#allocation6], %s333_s16 }
  0x5c   : > { %2598 = dma.done.wait (%p2776_p1), %s334_s29, 256  }
  0x5d   : > { %2600 = vsyncadd (%p2776_p1), %s334_s29, 4294967040  ;;  %s347_s3 = scalar_lea.vmem [#allocation7], %s2829_s15 }
  0x5e   : > { %2602 = dma.done.wait (%p52_p9), [#allocation9], 1024  }
  0x5f   : > { %2604 = vsyncadd (%p52_p9), [#allocation9], 4294966272  ;;  %v399_v0 = vld [vmem:[%s327_s22] sm:$0xff]  ;;  %vm452_vm0 = vcmask 64512   ;;  %v2851_v2 = vld [vmem:[%s337_s18] sm:$0xff]  ;;  %v485_v58 = vlaneseq  ;;  %vm495_vm1 = vcmask 1041409  }
  0x60   : > { %v2383_v1 = vld [vmem:[%s3165_s5] ss:$0 sm:$0xff]  ;;  %v514_v4 = vsel %vm452_vm0, %v2851_v2, 0  ;;  %v402_v6 = vld [vmem:[#allocation8] sm:$0xff]  ;;  %v403_v22 = vld [vmem:[#allocation8 + $0x8] sm:$0xff]  ;;  %vm497_vm2 = vcmask 1042434  }
  0x61   : > { %v419_v3 = vadd.f32 %v2383_v1, %v399_v0  ;;  %v2384_v5 = vld [vmem:[%s3164_s4] ss:$0 sm:$0xff]  ;;  %v531_v7 = vand.u32 4294901760, %v514_v4  ;;  %v406_v13 = vld [vmem:[#allocation8 + $0x20] sm:$0xff]  ;;  %v405_v31 = vld [vmem:[#allocation8 + $0x18] sm:$0xff]  ;;  %v2894_v61 = vand.u32 127, %v485_v58 }
  0x62   : > { %v404_v12 = vld [vmem:[#allocation8 + $0x10] sm:$0xff]  ;;  %v2858_v15 = vadd.f32 %v2384_v5, %v399_v0  ;;  %v407_v36 = vld [vmem:[#allocation8 + $0x28] sm:$0xff]  ;;  %v409_v52 = vld [vmem:[#allocation8 + $0x38] sm:$0xff]  ;;  %vm499_vm3 = vcmask 1043459   ;;  %vm501_vm4 = vcmask 1044484   ;;  %vm503_vm5 = vcmask 1045509  }
  0x63   : > { %v428_v8 = vperm.slane %v419_v3, 0  ;;  %v422_v9 = vrot.slane %v419_v3, 2  ;;  %v424_v10 = vrot.slane %v419_v3, 4  ;;  %v421_v11 = vrot.slane %v419_v3, 1  ;;  %532 = vmatpush.xpose.msra.mxu0 %v531_v7  ;;  %608 = vmatpush.xpose.msra.mxu3 %v531_v7  ;;  %v408_v47 = vld [vmem:[#allocation8 + $0x30] sm:$0xff]  ;;  %s2632_s23 = smov 120  }
  0x64   : > { %v558_v14 = vsub.f32 %v514_v4, %v531_v7  ;;  %v423_v16 = vrot.slane %v419_v3, 3  ;;  %v425_v17 = vrot.slane %v419_v3, 5  ;;  %v511_v23 = vsel %vm452_vm0, %v2858_v15, 0  ;;  %s2290_s19 = sshll.u32 %s2826_s14, 5  ;;  %s2633_s27 = smov 112  }
  0x65   : > { %v2860_v18 = vmul.f32 %v428_v8, %v402_v6  ;;  %v430_v19 = vperm.slane %v422_v9, 0  ;;  %v432_v20 = vperm.slane %v424_v10, 0  ;;  %v429_v21 = vperm.slane %v421_v11, 0  ;;  %s2959_s24 = scalar_lea.vmem [#allocation11], %s2290_s19  ;;  %s2634_s12 = smov 104  }
  0x66   : > { %585 = vmatpush.xpose.msra.mxu2 %v558_v14  ;;  %v559_v24 = vand.u32 4294901760, %v558_v14  ;;  %v431_v28 = vperm.slane %v423_v16, 0  ;;  %v533_v29 = vand.u32 4294901760, %v511_v23  ;;  %v433_v32 = vperm.slane %v425_v17, 0  ;;  %s2635_s20 = smov 8   ;;  %s2636_s1 = smov 16  }
  0x67   : > { %v453_v25 = vsel %vm452_vm0, %v2860_v18, 0.0  ;;  %v2866_v26 = vmul.f32 %v430_v19, %v404_v12  ;;  %v2868_v27 = vmul.f32 %v432_v20, %v406_v13  ;;  %v2874_v35 = vmul.f32 %v429_v21, %v403_v22  ;;  %s2301_s17 = sshll.u32 %s2700_s28, 5  ;;  %s2112_s16 = sshll.u32 %s2959_s24, 4  ;;  %s2113_s16 = int_to_ptr.vmem [resolvable:$true] %s2112_s16 }
  0x68   : > { %454 = vadd.xlane.f32.xlu0 %v453_v25  ;;  %v560_v30 = vsub.f32 %v558_v14, %v559_v24  ;;  %634 = vmatpush.xpose.msrb.mxu0 %v559_v24  ;;  %v426_v37 = vrot.slane %v419_v3, 6  ;;  %v534_v38 = vsub.f32 %v511_v23, %v533_v29  ;;  %v2876_v40 = vmul.f32 %v431_v28, %v405_v31  ;;  %s2111_s22 = scalar_lea.hbm %s3167_s7, %s2301_s17  ;;  %s2086_s18 = scalar_lea.sflag [#allocation12], %s2826_s14 }
  0x69   : > { %v459_v33 = vsel %vm452_vm0, %v2866_v26, 0.0  ;;  %v465_v34 = vsel %vm452_vm0, %v2868_v27, 0.0  ;;  %v427_v41 = vrot.slane %v419_v3, 7  ;;  %v2878_v43 = vmul.f32 %v433_v32, %v407_v36  ;;  %s2114_s29 = sshll.u32 %s2111_s22, 4  ;;  %s2541_s8 = scalar_lea.hbm %s3167_s7, 64  ;;  %s2115_s29 = int_to_ptr.hbm [resolvable:$true] %s2114_s29 }
  0x6a   : > { %460 = vadd.xlane.f32.xlu1 %v459_v33  ;;  %466 = vadd.xlane.f32.xlu2 %v465_v34  ;;  %v561_v39 = vand.u32 4294901760, %v560_v30  ;;  %v535_v42 = vand.u32 4294901760, %v534_v38  ;;  %v456_v44 = vsel %vm452_vm0, %v2874_v35, 0.0  ;;  %v434_v45 = vperm.slane %v426_v37, 0 }
  0x6b   : > { %588 = vmatmul.f32.vlgmr.msra.gmra.mxu2 %v534_v38  ;;  %v462_v48 = vsel %vm452_vm0, %v2876_v40, 0.0  ;;  %v435_v49 = vperm.slane %v427_v41, 0  ;;  %v468_v51 = vsel %vm452_vm0, %v2878_v43, 0.0  ;;  %vm505_vm6 = vcmask 1046534  }
  0x6c   : > { %562 = vmatpush.xpose.msra.mxu1 %v561_v39  ;;  %v536_v46 = vsub.f32 %v534_v38, %v535_v42  ;;  %612 = vmatmul.f32.vlgmr.msra.gmra.mxu3 %v535_v42  ;;  %v2886_v53 = vmul.f32 %v434_v45, %v408_v47  ;;  %vm507_vm7 = vcmask 1047559   ;;  %v2938_v45 = vld [vmem:[%s347_s3] sm:$0xff]  ;;  %s2535_s3 = sshra.s32 %s2115_s29, 4  ;;  %s2536_s3 = int_to_ptr.hbm [resolvable:$true] %s2535_s3 }
  0x6d   : > { %v2888_v54 = vmul.f32 %v435_v49, %v409_v52  ;;  %s2537_s30 = scalar_lea.hbm %s2536_s3, 32  ;;  %p2542_p1 = scmp.lt.s32.totalorder %s2536_s3, %s3167_s7 }
  0x6e   : > { %v537_v50 = vand.u32 4294901760, %v536_v46  ;;  %v471_v55 = vsel %vm452_vm0, %v2886_v53, 0.0  ;;  %v706_v46 = vand.u32 4294901760, %v2938_v45  ;;  %p2538_p11 = scmp.ne.s32.totalorder %s2536_s3, %s2537_s30  ;;  %p2543_p2 = scmp.lt.s32.totalorder %s2541_s8, %s2537_s30 }
  0x6f   : > { %564 = vmatmul.f32.vlgmr.msra.gmra.mxu1 %v533_v29  ;;  %v474_v56 = vsel %vm452_vm0, %v2888_v54, 0.0 }
  0x70   : > { %656 = vmatpush.xpose.msrb.mxu1 %v531_v7  ;;  %457 = vadd.xlane.f32.xlu0 %v456_v44  ;;  %p2539_p13 = pnand %p2538_p11, %p2718_p6  ;;  %p2544_p3 = por %p2543_p2, %p2542_p1 }
  0x71   : > { %538 = vmatmul.f32.vlgmr.msra.gmra.mxu0 %v537_v50  ;;  %707 = vmatpush.msrb.mxu2 %v706_v46 }
  0x72   : > { %463 = vadd.xlane.f32.xlu1 %v462_v48  ;;  %469 = vadd.xlane.f32.xlu2 %v468_v51  ;;  %v733_v48 = vsub.f32 %v2938_v45, %v706_v46  ;;  %p2540_p9 = pneg %p2539_p13 }
  0x74   : > { %783 = vmatpush.msra.mxu1 %v706_v46  ;;  %v734_v49 = vand.u32 4294901760, %v733_v48  ;;  %760 = vmatpush.msra.mxu0 %v733_v48  ;;  %p2545_p8 = pnand %p2544_p3, %p2540_p9 }
  0x76   : > { %v735_v52 = vsub.f32 %v733_v48, %v734_v49  ;;  %809 = vmatpush.msra.mxu2 %v734_v49 }
  0x77   : > { %658 = vmatmul.f32.vlgmr.msrb.gmra.mxu1 %v533_v29 }
  0x78   : > { %472 = vadd.xlane.f32.xlu0 %v471_v55 }
  0x79   : > { %636 = vmatmul.f32.vlgmr.msrb.gmra.mxu0 %v533_v29 }
  0x7a   : > { %475 = vadd.xlane.f32.xlu1 %v474_v56  ;;  %v736_v56 = vand.u32 4294901760, %v735_v52 }
  0x7c   : > { %737 = vmatpush.msrb.mxu3 %v736_v56 }
  0x7e   : > { %831 = vmatpush.msra.mxu3 %v706_v46 }
  0x93   : > { %895 = vrot.lane.b32.xlu1 %v2851_v2, %s2632_s23 }
  0x9b   : > { %849 = vrot.lane.b32.xlu1 %v2866_v26, %s2632_s23 }
  0xa3   : > { %855 = vrot.lane.b32.xlu1 %v2878_v43, %s2632_s23 }
  0xdb   : > { %v455_v57 = vpop.xlane.xlu0 %454 }
  0xdc   : > { %v487_v63 = vperm.slane %v455_v57, %v2894_v61 }
  0xdd   : > { %v461_v59 = vpop.xlane.xlu1 %460  ;;  %v467_v60 = vpop.xlane.xlu2 %466 }
  0xde   : > { %v489_v1 = vperm.slane %v461_v59, %v2894_v61  ;;  %v491_v8 = vperm.slane %v467_v60, %v2894_v61 }
  0xe3   : > { %v458_v62 = vpop.xlane.xlu0 %457 }
  0xe4   : > { %v488_v0 = vperm.slane %v458_v62, %v2894_v61 }
  0xe5   : > { %v464_v3 = vpop.xlane.xlu1 %463  ;;  %v470_v6 = vpop.xlane.xlu2 %469 }
  0xe6   : > { %v496_v4 = vsel %vm495_vm1, %v488_v0, %v487_v63  ;;  %v490_v5 = vperm.slane %v464_v3, %v2894_v61  ;;  %v492_v10 = vperm.slane %v470_v6, %v2894_v61 }
  0xe7   : > { %v498_v7 = vsel %vm497_vm2, %v489_v1, %v496_v4 }
  0xe8   : > { %v500_v9 = vsel %vm499_vm3, %v490_v5, %v498_v7 }
  0xe9   : > { %v502_v11 = vsel %vm501_vm4, %v491_v8, %v500_v9 }
  0xea   : > { %v504_v14 = vsel %vm503_vm5, %v492_v10, %v502_v11 }
  0xeb   : > { %v473_v12 = vpop.xlane.xlu0 %472 }
  0xec   : > { %v493_v13 = vperm.slane %v473_v12, %v2894_v61  ;;  %v565_v20 = vpop.f32.mrf.mxu1 }
  0xed   : > { %v476_v16 = vpop.xlane.xlu1 %475 }
  0xee   : > { %v494_v17 = vperm.slane %v476_v16, %v2894_v61  ;;  %v506_v19 = vsel %vm505_vm6, %v493_v13, %v504_v14  ;;  %v539_v21 = vpop.f32.mrf.mxu0  ;;  %v589_v24 = vpop.f32.mrf.mxu2 }
  0xef   : > { %v613_v28 = vpop.f32.mrf.mxu3 }
  0xf0   : > { %v508_v22 = vsel %vm507_vm7, %v494_v17, %v506_v19 }
  0xf1   : > { %v540_v23 = vadd.f32 %v539_v21, %v508_v22 }
  0xf3   : > { %v566_v25 = vadd.f32 %v565_v20, %v540_v23 }
  0xf4   : > { %v659_v32 = vpop.f32.mrf.mxu1 }
  0xf5   : > { %v590_v29 = vadd.f32 %v589_v24, %v566_v25 }
  0xf6   : > { %v637_v31 = vpop.f32.mrf.mxu0 }
  0xf7   : > { %v614_v30 = vadd.f32 %v613_v28, %v590_v29 }
  0xf9   : > { %v638_v33 = vadd.f32 %v637_v31, %v614_v30 }
  0xfb   : > { %v660_v34 = vadd.f32 %v659_v32, %v638_v33 }
  0xfd   : > { %v662_v36 = vmul.f32 0.35355338, %v660_v34 }
  0xff   : > { %v663_v37 = vsel %vm452_vm0, %v662_v36, -inf }
 0x100   : > { %664 = vmax.xlane.f32.xlu2 %v663_v37 }
 0x105   : > { %v896_v50 = vpop.permute.xlu1 %895 }
 0x106   : > { %v923_v51 = vsel %vm452_vm0, %v896_v50, 0 }
 0x107   : > { %v2943_v55 = vand.u32 4294901760, %v923_v51 }
 0x109   : > { %v2946_v57 = vsub.f32 %v923_v51, %v2943_v55  ;;  %941 = vmatpush.xpose.msrb.mxu0 %v2943_v55 }
 0x10b   : > { %v968_v59 = vand.u32 4294901760, %v2946_v57 }
 0x10d   : > { %v969_v62 = vsub.f32 %v2946_v57, %v968_v59  ;;  %v850_v0 = vpop.permute.xlu1 %849 }
 0x10e   : > { %v875_v1 = vsel %vm452_vm0, %v850_v0, 0.0 }
 0x10f   : > { %v970_v63 = vand.u32 4294901760, %v969_v62 }
 0x111   : > { %971 = vmatpush.xpose.msrb.mxu1 %v970_v63 }
 0x115   : > { %v856_v6 = vpop.permute.xlu1 %855 }
 0x116   : > { %v884_v7 = vsel %vm452_vm0, %v856_v6, 0.0 }
 0x118   : > { %893 = vrot.lane.b32.xlu2 %v2858_v15, %s2632_s23 }
 0x120   : > { %847 = vrot.lane.b32.xlu2 %v2874_v35, %s2632_s23 }
 0x128   : > { %853 = vrot.lane.b32.xlu2 %v2868_v27, %s2632_s23 }
 0x130   : > { %859 = vrot.lane.b32.xlu2 %v2888_v54, %s2632_s23 }
 0x159   : > { %876 = vadd.xlane.f32.xlu2 %v875_v1 }
 0x161   : > { %885 = vadd.xlane.f32.xlu2 %v884_v7 }
 0x173   : > { %v665_v38 = vpop.xlane.xlu2 %664 }
 0x174   : > { %v666_v39 = vsub.f32 %v662_v36, %v665_v38 }
 0x176   : > { %v667_v41 = vmul.f32 1.442695, %v666_v39 }
 0x178   : > { %2385 = vpow2.f32 %v667_v41 }
 0x17b   : > { %v894_v47 = vpop.permute.xlu2 %893 }
 0x17c   : > { %v921_v13 = vsel %vm452_vm0, %v894_v47, 0 }
 0x17d   : > { %v942_v19 = vand.u32 4294901760, %v921_v13 }
 0x17e   : > { %v2926_v42 = vpop.eup %2385 }
 0x17f   : > { %v669_v44 = vsel %vm452_vm0, %v2926_v42, 0.0  ;;  %v943_v24 = vsub.f32 %v921_v13, %v942_v19 }
 0x180   : > { %670 = vadd.xlane.f32.xlu0 %v669_v44 }
 0x181   : > { %v944_v31 = vand.u32 4294901760, %v943_v24 }
 0x183   : > { %v848_v58 = vpop.permute.xlu2 %847  ;;  %v945_v34 = vsub.f32 %v943_v24, %v944_v31 }
 0x184   : > { %v872_v60 = vsel %vm452_vm0, %v848_v58, 0.0 }
 0x185   : > { %v946_v41 = vand.u32 4294901760, %v945_v34 }
 0x18b   : > { %v854_v3 = vpop.permute.xlu2 %853 }
 0x18c   : > { %v881_v4 = vsel %vm452_vm0, %v854_v3, 0.0 }
 0x193   : > { %v860_v8 = vpop.permute.xlu2 %859 }
 0x194   : > { %845 = vrot.lane.b32.xlu0 %v2860_v18, %s2632_s23  ;;  %v890_v10 = vsel %vm452_vm0, %v860_v8, 0.0 }
 0x19c   : > { %851 = vrot.lane.b32.xlu0 %v2876_v40, %s2632_s23 }
 0x1a4   : > { %857 = vrot.lane.b32.xlu0 %v2886_v53, %s2632_s23 }
 0x1cc   : > { %v877_v49 = vpop.xlane.xlu2 %876 }
 0x1ce   : > { %873 = vadd.xlane.f32.xlu0 %v872_v60 }
 0x1d4   : > { %v886_v62 = vpop.xlane.xlu2 %885 }
 0x1d5   : > { %v910_v1 = vperm.slane %v886_v62, %v2894_v61 }
 0x1d6   : > { %882 = vadd.xlane.f32.xlu0 %v881_v4 }
 0x1de   : > { %891 = vadd.xlane.f32.xlu0 %v890_v10 }
 0x1f2   : > { %1099 = vrot.lane.b32.xlu0 %v2938_v45, %s2632_s23 }
 0x1f3   : > { %v671_v5 = vpop.xlane.xlu0 %670 }
 0x1f4   : > { %2387 = vrcp.f32 %v671_v5  ;;  %v683_v14 = vand.u32 2147483648, %v671_v5  ;;  %v681_v17 = vand.u32 2147483647, %v671_v5  ;;  %vm677_vm9 = vweird.f32 %v671_v5 }
 0x1f6   : > { %v684_v21 = vor.u32 1.1754944e-38, %v683_v14  ;;  %vm682_vm11 = vcmp.eq.f32.partialorder %v681_v17, 8.507059e+37 }
 0x1fa   : > { %v2388_v9 = vpop.eup %2387  ;;  %1251 = vrot.lane.b32.xlu0 %v2860_v18, %s2633_s27 }
 0x1fb   : > { %v673_v11 = vmul.f32 %v2388_v9, %v671_v5  ;;  %vm678_vm8 = vweird.f32 %v2388_v9 }
 0x1fc   : > { %vm679_vm10 = vmor %vm677_vm9, %vm678_vm8 }
 0x1fd   : > { %v674_v12 = vsub.f32 1.0, %v673_v11 }
 0x1ff   : > { %v675_v16 = vmul.f32 %v2388_v9, %v674_v12 }
 0x201   : > { %v676_v20 = vadd.f32 %v2388_v9, %v675_v16 }
 0x202   : > { %1255 = vrot.lane.b32.xlu0 %v2866_v26, %s2633_s27 }
 0x203   : > { %v680_v22 = vsel %vm679_vm10, %v2388_v9, %v676_v20 }
 0x204   : > { %v685_v23 = vsel %vm682_vm11, %v684_v21, %v680_v22 }
 0x205   : > { %v686_v25 = vmul.f32 %v2926_v42, %v685_v23 }
 0x206   : > { %v846_v28 = vpop.permute.xlu0 %845 }
 0x207   : > { %687 = vst.msk [vmem:[%s2959_s24] sm:$0xff] %vm452_vm0, %v686_v25  ;;  %v689_v29 = vsel %vm452_vm0, %v686_v25, 0  ;;  %v869_v30 = vsel %vm452_vm0, %v846_v28, 0.0 }
 0x208   : > { %v708_v32 = vand.u32 4294901760, %v689_v29  ;;  %870 = vadd.xlane.f32.xlu1 %v869_v30 }
 0x20a   : > { %739 = vmatmul.f32.vlgmr.msrb.gmra.mxu3 %v708_v32  ;;  %v709_v33 = vsub.f32 %v689_v29, %v708_v32  ;;  %1261 = vrot.lane.b32.xlu0 %v2878_v43, %s2633_s27 }
 0x20b   : > { %1017 = vmatpush.xpose.msrb.mxu3 %v2943_v55 }
 0x20c   : > { %763 = vmatmul.f32.vlgmr.msra.gmra.mxu0 %v709_v33  ;;  %v710_v36 = vand.u32 4294901760, %v709_v33 }
 0x20d   : > { %1043 = vmatpush.xpose.msra.mxu0 %v968_v59 }
 0x20e   : > { %787 = vmatmul.f32.vlgmr.msra.gmra.mxu1 %v710_v36  ;;  %v852_v37 = vpop.permute.xlu0 %851  ;;  %v711_v38 = vsub.f32 %v709_v33, %v710_v36 }
 0x20f   : > { %v878_v39 = vsel %vm452_vm0, %v852_v37, 0.0  ;;  %1065 = vmatpush.xpose.msra.mxu1 %v2943_v55  ;;  %v907_v55 = vperm.slane %v877_v49, %v2894_v61 }
 0x210   : > { %v712_v42 = vand.u32 4294901760, %v711_v38  ;;  %879 = vadd.xlane.f32.xlu1 %v878_v39 }
 0x212   : > { %713 = vmatmul.f32.vlgmr.msrb.gmra.mxu2 %v712_v42  ;;  %833 = vmatmul.f32.vlgmr.msra.gmra.mxu3 %v708_v32 }
 0x213   : > { %994 = vmatpush.xpose.msrb.mxu2 %v2946_v57 }
 0x214   : > { %947 = vmatmul.f32.vlgmr.msrb.gmra.mxu0 %v946_v41 }
 0x216   : > { %973 = vmatmul.f32.vlgmr.msrb.gmra.mxu1 %v942_v19  ;;  %v858_v44 = vpop.permute.xlu0 %857 }
 0x217   : > { %v887_v46 = vsel %vm452_vm0, %v858_v44, 0.0 }
 0x218   : > { %888 = vadd.xlane.f32.xlu1 %v887_v46 }
 0x21a   : > { %811 = vmatmul.f32.vlgmr.msra.gmra.mxu2 %v708_v32  ;;  %1021 = vmatmul.f32.vlgmr.msrb.gmra.mxu3 %v944_v31 }
 0x21c   : > { %1045 = vmatmul.f32.vlgmr.msra.gmra.mxu0 %v942_v19 }
 0x21e   : > { %1067 = vmatmul.f32.vlgmr.msra.gmra.mxu1 %v942_v19 }
 0x222   : > { %997 = vmatmul.f32.vlgmr.msrb.gmra.mxu2 %v943_v24 }
 0x241   : > { %v874_v48 = vpop.xlane.xlu0 %873 }
 0x242   : > { %v906_v51 = vperm.slane %v874_v48, %v2894_v61 }
 0x249   : > { %v883_v57 = vpop.xlane.xlu0 %882 }
 0x24a   : > { %v909_v60 = vperm.slane %v883_v57, %v2894_v61 }
 0x251   : > { %v892_v8 = vpop.xlane.xlu0 %891 }
 0x252   : > { %v912_v13 = vperm.slane %v892_v8, %v2894_v61 }
 0x264   : > { %v1100_v48 = vpop.permute.xlu0 %1099 }
 0x265   : > { %v1120_v49 = vand.u32 4294901760, %v1100_v48 }
 0x267   : > { %1121 = vmatpush.msra.mxu2 %v1120_v49  ;;  %1197 = vmatpush.msrb.mxu1 %v1120_v49 }
 0x26c   : > { %v1252_v62 = vpop.permute.xlu0 %1251 }
 0x27b   : > { %v871_v47 = vpop.xlane.xlu1 %870 }
 0x27c   : > { %v905_v50 = vperm.slane %v871_v47, %v2894_v61 }
 0x27e   : > { %v913_v56 = vsel %vm495_vm1, %v906_v51, %v905_v50  ;;  %v1147_v50 = vsub.f32 %v1100_v48, %v1120_v49 }
 0x27f   : > { %v914_v59 = vsel %vm497_vm2, %v907_v55, %v913_v56 }
 0x280   : > { %v1148_v51 = vand.u32 4294901760, %v1147_v50  ;;  %1174 = vmatpush.msrb.mxu0 %v1147_v50 }
 0x282   : > { %v1149_v55 = vsub.f32 %v1147_v50, %v1148_v51  ;;  %1223 = vmatpush.msrb.mxu2 %v1148_v51 }
 0x283   : > { %v880_v52 = vpop.xlane.xlu1 %879 }
 0x284   : > { %v908_v58 = vperm.slane %v880_v52, %v2894_v61 }
 0x286   : > { %v915_v63 = vsel %vm499_vm3, %v908_v58, %v914_v59  ;;  %v1150_v58 = vand.u32 4294901760, %v1149_v55 }
 0x287   : > { %v916_v5 = vsel %vm501_vm4, %v909_v60, %v915_v63 }
 0x288   : > { %v917_v11 = vsel %vm503_vm5, %v910_v1, %v916_v5  ;;  %1151 = vmatpush.msra.mxu3 %v1150_v58  ;;  %v1275_v1 = vsel %vm452_vm0, %v1252_v62, 0.0 }
 0x289   : > { %v764_v0 = vpop.f32.mrf.mxu0  ;;  %1276 = vadd.xlane.f32.xlu0 %v1275_v1 }
 0x28a   : > { %1245 = vmatpush.msrb.mxu3 %v1120_v49 }
 0x28b   : > { %v889_v4 = vpop.xlane.xlu1 %888  ;;  %v788_v10 = vpop.f32.mrf.mxu1 }
 0x28c   : > { %v911_v7 = vperm.slane %v889_v4, %v2894_v61 }
 0x28d   : > { %v740_v3 = vpop.f32.mrf.mxu3 }
 0x28e   : > { %v918_v14 = vsel %vm505_vm6, %v911_v7, %v917_v11 }
 0x28f   : > { %v919_v19 = vsel %vm507_vm7, %v912_v13, %v918_v14 }
 0x291   : > { %v948_v17 = vpop.f32.mrf.mxu0 }
 0x292   : > { %v949_v23 = vadd.f32 %v948_v17, %v919_v19 }
 0x293   : > { %v974_v25 = vpop.f32.mrf.mxu1 }
 0x294   : > { %v975_v28 = vadd.f32 %v974_v25, %v949_v23 }
 0x295   : > { %v714_v6 = vpop.f32.mrf.mxu2  ;;  %v834_v20 = vpop.f32.mrf.mxu3 }
 0x296   : > { %v741_v9 = vadd.f32 %v740_v3, %v714_v6  ;;  %v1256_v6 = vpop.permute.xlu0 %1255 }
 0x297   : > { %v1281_v7 = vsel %vm452_vm0, %v1256_v6, 0.0 }
 0x298   : > { %v765_v12 = vadd.f32 %v764_v0, %v741_v9 }
 0x299   : > { %v1046_v33 = vpop.f32.mrf.mxu0 }
 0x29a   : > { %v789_v16 = vadd.f32 %v788_v10, %v765_v12 }
 0x29b   : > { %v1068_v36 = vpop.f32.mrf.mxu1 }
 0x29d   : > { %v812_v21 = vpop.f32.mrf.mxu2  ;;  %v1022_v31 = vpop.f32.mrf.mxu3 }
 0x29e   : > { %v813_v22 = vadd.f32 %v812_v21, %v789_v16  ;;  %v1262_v12 = vpop.permute.xlu0 %1261 }
 0x29f   : > { %v1290_v13 = vsel %vm452_vm0, %v1262_v12, 0.0 }
 0x2a0   : > { %v2987_v24 = vadd.f32 %v834_v20, %v813_v22 }
 0x2a5   : > { %v998_v29 = vpop.f32.mrf.mxu2 }
 0x2a6   : > { %v999_v30 = vadd.f32 %v998_v29, %v975_v28 }
 0x2a8   : > { %v1023_v32 = vadd.f32 %v1022_v31, %v999_v30 }
 0x2aa   : > { %v1047_v34 = vadd.f32 %v1046_v33, %v1023_v32 }
 0x2ac   : > { %v1069_v37 = vadd.f32 %v1068_v36, %v1047_v34 }
 0x2ae   : > { %v1071_v38 = vmul.f32 0.35355338, %v1069_v37 }
 0x2b0   : > { %v1072_v39 = vsel %vm452_vm0, %v1071_v38, -inf }
 0x2b1   : > { %1073 = vmax.xlane.f32.xlu2 %v1072_v39 }
 0x2c9   : > { %1301 = vrot.lane.b32.xlu2 %v2851_v2, %s2633_s27 }
 0x2d1   : > { %1253 = vrot.lane.b32.xlu2 %v2874_v35, %s2633_s27 }
 0x2d9   : > { %1259 = vrot.lane.b32.xlu2 %v2868_v27, %s2633_s27 }
 0x2e1   : > { %1265 = vrot.lane.b32.xlu2 %v2888_v54, %s2633_s27 }
 0x2fc   : > { %v1277_v51 = vpop.xlane.xlu0 %1276 }
 0x30a   : > { %1282 = vadd.xlane.f32.xlu2 %v1281_v7 }
 0x312   : > { %1291 = vadd.xlane.f32.xlu2 %v1290_v13 }
 0x324   : > { %v1074_v41 = vpop.xlane.xlu2 %1073 }
 0x325   : > { %v1075_v42 = vsub.f32 %v1071_v38, %v1074_v41 }
 0x327   : > { %v1076_v44 = vmul.f32 1.442695, %v1075_v42 }
 0x329   : > { %2389 = vpow2.f32 %v1076_v44 }
 0x32c   : > { %v1302_v52 = vpop.permute.xlu2 %1301 }
 0x32d   : > { %v1329_v56 = vsel %vm452_vm0, %v1302_v52, 0 }
 0x32e   : > { %v1346_v57 = vand.u32 4294901760, %v1329_v56 }
 0x32f   : > { %v2390_v46 = vpop.eup %2389 }
 0x330   : > { %v1078_v47 = vsel %vm452_vm0, %v2390_v46, 0.0  ;;  %v3012_v59 = vsub.f32 %v1329_v56, %v1346_v57  ;;  %1347 = vmatpush.xpose.msra.mxu0 %v1346_v57  ;;  %v1311_v56 = vperm.slane %v1277_v51, %v2894_v61 }
 0x331   : > { %1079 = vadd.xlane.f32.xlu1 %v1078_v47 }
 0x332   : > { %v1374_v60 = vand.u32 4294901760, %v3012_v59 }
 0x334   : > { %v1375_v63 = vsub.f32 %v3012_v59, %v1374_v60  ;;  %v1254_v0 = vpop.permute.xlu2 %1253 }
 0x335   : > { %v1278_v4 = vsel %vm452_vm0, %v1254_v0, 0.0 }
 0x336   : > { %v1376_v3 = vand.u32 4294901760, %v1375_v63 }
 0x338   : > { %1377 = vmatpush.xpose.msra.mxu1 %v1376_v3 }
 0x33c   : > { %v1260_v8 = vpop.permute.xlu2 %1259 }
 0x33d   : > { %v1287_v9 = vsel %vm452_vm0, %v1260_v8, 0.0 }
 0x344   : > { %v1266_v16 = vpop.permute.xlu2 %1265 }
 0x345   : > { %v1296_v19 = vsel %vm452_vm0, %v1266_v16, 0.0 }
 0x34a   : > { %1299 = vrot.lane.b32.xlu1 %v2858_v15, %s2633_s27 }
 0x352   : > { %1257 = vrot.lane.b32.xlu1 %v2876_v40, %s2633_s27 }
 0x35a   : > { %1263 = vrot.lane.b32.xlu1 %v2886_v53, %s2633_s27 }
 0x37d   : > { %v1283_v55 = vpop.xlane.xlu2 %1282 }
 0x384   : > { %1279 = vadd.xlane.f32.xlu1 %v1278_v4 }
 0x385   : > { %v1292_v3 = vpop.xlane.xlu2 %1291 }
 0x38c   : > { %1288 = vadd.xlane.f32.xlu1 %v1287_v9 }
 0x394   : > { %1297 = vadd.xlane.f32.xlu1 %v1296_v19 }
 0x3a4   : > { %v1080_v5 = vpop.xlane.xlu1 %1079 }
 0x3a5   : > { %2391 = vrcp.f32 %v1080_v5  ;;  %v1092_v17 = vand.u32 2147483648, %v1080_v5  ;;  %v1090_v21 = vand.u32 2147483647, %v1080_v5  ;;  %vm1086_vm13 = vweird.f32 %v1080_v5 }
 0x3a7   : > { %v1093_v23 = vor.u32 1.1754944e-38, %v1092_v17  ;;  %vm1091_vm15 = vcmp.eq.f32.partialorder %v1090_v21, 8.507059e+37 }
 0x3ab   : > { %v2392_v10 = vpop.eup %2391 }
 0x3ac   : > { %v1082_v11 = vmul.f32 %v2392_v10, %v1080_v5  ;;  %vm1087_vm12 = vweird.f32 %v2392_v10  ;;  %v1316_v5 = vperm.slane %v1292_v3, %v2894_v61 }
 0x3ad   : > { %vm1088_vm14 = vmor %vm1086_vm13, %vm1087_vm12  ;;  %1504 = vrot.lane.b32.xlu1 %v2938_v45, %s2633_s27 }
 0x3ae   : > { %v1083_v14 = vsub.f32 1.0, %v1082_v11 }
 0x3b0   : > { %v1084_v20 = vmul.f32 %v2392_v10, %v1083_v14 }
 0x3b2   : > { %v1085_v22 = vadd.f32 %v2392_v10, %v1084_v20 }
 0x3b4   : > { %v1089_v25 = vsel %vm1088_vm14, %v2392_v10, %v1085_v22 }
 0x3b5   : > { %v1094_v28 = vsel %vm1091_vm15, %v1093_v23, %v1089_v25  ;;  %1656 = vrot.lane.b32.xlu1 %v2860_v18, %s2634_s12 }
 0x3b6   : > { %v1095_v29 = vmul.f32 %v2390_v46, %v1094_v28 }
 0x3b8   : > { %2291 = vst.msk [vmem:[%s2959_s24 + $0x8] sm:$0xff] %vm452_vm0, %v1095_v29  ;;  %v1103_v30 = vsel %vm452_vm0, %v1095_v29, 0 }
 0x3b9   : > { %v1122_v31 = vand.u32 4294901760, %v1103_v30 }
 0x3bb   : > { %1153 = vmatmul.f32.vlgmr.msra.gmra.mxu3 %v1122_v31  ;;  %v1123_v32 = vsub.f32 %v1103_v30, %v1122_v31 }
 0x3bc   : > { %v1300_v33 = vpop.permute.xlu1 %1299  ;;  %1423 = vmatpush.xpose.msra.mxu3 %v1346_v57 }
 0x3bd   : > { %v1327_v34 = vsel %vm452_vm0, %v1300_v33, 0  ;;  %1177 = vmatmul.f32.vlgmr.msrb.gmra.mxu0 %v1123_v32  ;;  %v1124_v36 = vand.u32 4294901760, %v1123_v32  ;;  %1662 = vrot.lane.b32.xlu1 %v2876_v40, %s2634_s12 }
 0x3be   : > { %v1348_v37 = vand.u32 4294901760, %v1327_v34  ;;  %1449 = vmatpush.xpose.msrb.mxu0 %v1374_v60 }
 0x3bf   : > { %1201 = vmatmul.f32.vlgmr.msrb.gmra.mxu1 %v1124_v36  ;;  %v1125_v38 = vsub.f32 %v1123_v32, %v1124_v36 }
 0x3c0   : > { %v1349_v39 = vsub.f32 %v1327_v34, %v1348_v37  ;;  %1471 = vmatpush.xpose.msrb.mxu1 %v1346_v57 }
 0x3c1   : > { %v1126_v41 = vand.u32 4294901760, %v1125_v38 }
 0x3c2   : > { %v1350_v42 = vand.u32 4294901760, %v1349_v39 }
 0x3c3   : > { %1127 = vmatmul.f32.vlgmr.msra.gmra.mxu2 %v1126_v41  ;;  %1247 = vmatmul.f32.vlgmr.msrb.gmra.mxu3 %v1122_v31 }
 0x3c4   : > { %v1351_v44 = vsub.f32 %v1349_v39, %v1350_v42  ;;  %v1258_v46 = vpop.permute.xlu1 %1257  ;;  %1400 = vmatpush.xpose.msra.mxu2 %v3012_v59  ;;  %v1313_v59 = vperm.slane %v1283_v55, %v2894_v61 }
 0x3c5   : > { %v1284_v47 = vsel %vm452_vm0, %v1258_v46, 0.0  ;;  %1668 = vrot.lane.b32.xlu1 %v2886_v53, %s2634_s12 }
 0x3c6   : > { %v1352_v48 = vand.u32 4294901760, %v1351_v44  ;;  %1285 = vadd.xlane.f32.xlu0 %v1284_v47 }
 0x3c7   : > { %1379 = vmatmul.f32.vlgmr.msra.gmra.mxu1 %v1348_v37 }
 0x3c8   : > { %1353 = vmatmul.f32.vlgmr.msra.gmra.mxu0 %v1352_v48 }
 0x3cb   : > { %1225 = vmatmul.f32.vlgmr.msrb.gmra.mxu2 %v1122_v31  ;;  %1427 = vmatmul.f32.vlgmr.msra.gmra.mxu3 %v1350_v42 }
 0x3cc   : > { %v1264_v49 = vpop.permute.xlu1 %1263 }
 0x3cd   : > { %v1293_v50 = vsel %vm452_vm0, %v1264_v49, 0.0 }
 0x3ce   : > { %1294 = vadd.xlane.f32.xlu0 %v1293_v50 }
 0x3cf   : > { %1473 = vmatmul.f32.vlgmr.msrb.gmra.mxu1 %v1348_v37 }
 0x3d0   : > { %1451 = vmatmul.f32.vlgmr.msrb.gmra.mxu0 %v1348_v37 }
 0x3d3   : > { %1403 = vmatmul.f32.vlgmr.msra.gmra.mxu2 %v1349_v39 }
 0x3f7   : > { %v1280_v52 = vpop.xlane.xlu1 %1279 }
 0x3f8   : > { %v1312_v57 = vperm.slane %v1280_v52, %v2894_v61 }
 0x3fa   : > { %v1319_v60 = vsel %vm495_vm1, %v1312_v57, %v1311_v56 }
 0x3fb   : > { %v1320_v0 = vsel %vm497_vm2, %v1313_v59, %v1319_v60 }
 0x3ff   : > { %v1289_v62 = vpop.xlane.xlu1 %1288 }
 0x400   : > { %v1315_v1 = vperm.slane %v1289_v62, %v2894_v61 }
 0x407   : > { %v1298_v12 = vpop.xlane.xlu1 %1297 }
 0x408   : > { %v1318_v19 = vperm.slane %v1298_v12, %v2894_v61 }
 0x439   : > { %v1286_v58 = vpop.xlane.xlu0 %1285 }
 0x43a   : > { %v1314_v63 = vperm.slane %v1286_v58, %v2894_v61  ;;  %v1178_v7 = vpop.f32.mrf.mxu0 }
 0x43c   : > { %v1321_v4 = vsel %vm499_vm3, %v1314_v63, %v1320_v0  ;;  %v1202_v14 = vpop.f32.mrf.mxu1 }
 0x43d   : > { %v1322_v8 = vsel %vm501_vm4, %v1315_v1, %v1321_v4 }
 0x43e   : > { %v1154_v9 = vpop.f32.mrf.mxu3  ;;  %v1323_v16 = vsel %vm503_vm5, %v1316_v5, %v1322_v8 }
 0x441   : > { %v1295_v6 = vpop.xlane.xlu0 %1294 }
 0x442   : > { %v1317_v11 = vperm.slane %v1295_v6, %v2894_v61 }
 0x444   : > { %v1324_v20 = vsel %vm505_vm6, %v1317_v11, %v1323_v16  ;;  %v1380_v32 = vpop.f32.mrf.mxu1 }
 0x445   : > { %v1325_v22 = vsel %vm507_vm7, %v1318_v19, %v1324_v20  ;;  %v1354_v23 = vpop.f32.mrf.mxu0 }
 0x446   : > { %v1128_v10 = vpop.f32.mrf.mxu2  ;;  %v1248_v29 = vpop.f32.mrf.mxu3  ;;  %v1355_v30 = vadd.f32 %v1354_v23, %v1325_v22 }
 0x447   : > { %v1155_v13 = vadd.f32 %v1154_v9, %v1128_v10 }
 0x448   : > { %v1381_v33 = vadd.f32 %v1380_v32, %v1355_v30 }
 0x449   : > { %v1179_v17 = vadd.f32 %v1178_v7, %v1155_v13 }
 0x44b   : > { %v1203_v21 = vadd.f32 %v1202_v14, %v1179_v17 }
 0x44c   : > { %v1474_v42 = vpop.f32.mrf.mxu1 }
 0x44d   : > { %v1452_v39 = vpop.f32.mrf.mxu0 }
 0x44e   : > { %v1226_v25 = vpop.f32.mrf.mxu2  ;;  %v1428_v37 = vpop.f32.mrf.mxu3 }
 0x44f   : > { %v1227_v28 = vadd.f32 %v1226_v25, %v1203_v21 }
 0x451   : > { %v3046_v31 = vadd.f32 %v1248_v29, %v1227_v28 }
 0x456   : > { %v1404_v34 = vpop.f32.mrf.mxu2 }
 0x457   : > { %v1405_v36 = vadd.f32 %v1404_v34, %v1381_v33 }
 0x459   : > { %v1429_v38 = vadd.f32 %v1428_v37, %v1405_v36 }
 0x45b   : > { %v1453_v41 = vadd.f32 %v1452_v39, %v1429_v38 }
 0x45d   : > { %v1475_v44 = vadd.f32 %v1474_v42, %v1453_v41 }
 0x45f   : > { %v1477_v46 = vmul.f32 0.35355338, %v1475_v44 }
 0x461   : > { %v1478_v47 = vsel %vm452_vm0, %v1477_v46, -inf }
 0x462   : > { %1479 = vmax.xlane.f32.xlu2 %v1478_v47 }
 0x47a   : > { %1706 = vrot.lane.b32.xlu2 %v2851_v2, %s2634_s12  ;;  %v1505_v2 = vpop.permute.xlu1 %1504 }
 0x482   : > { %1660 = vrot.lane.b32.xlu2 %v2866_v26, %s2634_s12  ;;  %v1525_v26 = vand.u32 4294901760, %v1505_v2 }
 0x484   : > { %v1552_v40 = vsub.f32 %v1505_v2, %v1525_v26  ;;  %1526 = vmatpush.msrb.mxu2 %v1525_v26  ;;  %1602 = vmatpush.msra.mxu1 %v1525_v26 }
 0x486   : > { %1579 = vmatpush.msra.mxu0 %v1552_v40 }
 0x48a   : > { %1666 = vrot.lane.b32.xlu2 %v2878_v43, %s2634_s12  ;;  %v1553_v43 = vand.u32 4294901760, %v1552_v40 }
 0x48c   : > { %v1554_v53 = vsub.f32 %v1552_v40, %v1553_v43  ;;  %1628 = vmatpush.msra.mxu2 %v1553_v43 }
 0x48e   : > { %v1555_v52 = vand.u32 4294901760, %v1554_v53 }
 0x490   : > { %1556 = vmatpush.msrb.mxu3 %v1555_v52 }
 0x492   : > { %1650 = vmatpush.msra.mxu3 %v1525_v26 }
 0x4d5   : > { %v1480_v48 = vpop.xlane.xlu2 %1479 }
 0x4d6   : > { %v1481_v49 = vsub.f32 %v1477_v46, %v1480_v48 }
 0x4d8   : > { %v1482_v50 = vmul.f32 1.442695, %v1481_v49 }
 0x4da   : > { %2393 = vpow2.f32 %v1482_v50 }
 0x4e0   : > { %v2394_v18 = vpop.eup %2393 }
 0x4e1   : > { %v1484_v51 = vsel %vm452_vm0, %v2394_v18, 0.0 }
 0x4e2   : > { %1485 = vadd.xlane.f32.xlu0 %v1484_v51 }
 0x4f6   : > { %1704 = vrot.lane.b32.xlu0 %v2858_v15, %s2634_s12  ;;  %v1707_v15 = vpop.permute.xlu2 %1706 }
 0x4f7   : > { %v1734_v55 = vsel %vm452_vm0, %v1707_v15, 0 }
 0x4fe   : > { %1658 = vrot.lane.b32.xlu0 %v2874_v35, %s2634_s12  ;;  %v1751_v35 = vand.u32 4294901760, %v1734_v55  ;;  %v1661_v62 = vpop.permute.xlu2 %1660 }
 0x4ff   : > { %v1686_v0 = vsel %vm452_vm0, %v1661_v62, 0.0 }
 0x500   : > { %1752 = vmatpush.xpose.msrb.mxu0 %v1751_v35 }
 0x506   : > { %1664 = vrot.lane.b32.xlu0 %v2868_v27, %s2634_s12  ;;  %v1778_v27 = vsub.f32 %v1734_v55, %v1751_v35  ;;  %v1667_v5 = vpop.permute.xlu2 %1666 }
 0x507   : > { %v1695_v8 = vsel %vm452_vm0, %v1667_v5, 0.0 }
 0x508   : > { %v1779_v56 = vand.u32 4294901760, %v1778_v27 }
 0x50a   : > { %v1780_v58 = vsub.f32 %v1778_v27, %v1779_v56 }
 0x50c   : > { %v1781_v59 = vand.u32 4294901760, %v1780_v58 }
 0x50e   : > { %1670 = vrot.lane.b32.xlu0 %v2888_v54, %s2634_s12  ;;  %v1657_v54 = vpop.permute.xlu1 %1656  ;;  %1782 = vmatpush.xpose.msrb.mxu1 %v1781_v59 }
 0x50f   : > { %v1680_v57 = vsel %vm452_vm0, %v1657_v54, 0.0 }
 0x510   : > { %1681 = vadd.xlane.f32.xlu2 %v1680_v57 }
 0x516   : > { %v1663_v63 = vpop.permute.xlu1 %1662 }
 0x517   : > { %v1689_v1 = vsel %vm452_vm0, %v1663_v63, 0.0 }
 0x518   : > { %1690 = vadd.xlane.f32.xlu2 %v1689_v1 }
 0x51e   : > { %v1669_v7 = vpop.permute.xlu1 %1668 }
 0x51f   : > { %v1698_v10 = vsel %vm452_vm0, %v1669_v7, 0.0 }
 0x520   : > { %1699 = vadd.xlane.f32.xlu2 %v1698_v10 }
 0x538   : > { %1687 = vadd.xlane.f32.xlu0 %v1686_v0 }
 0x540   : > { %1696 = vadd.xlane.f32.xlu0 %v1695_v8 }
 0x555   : > { %v1486_v60 = vpop.xlane.xlu0 %1485 }
 0x556   : > { %2395 = vrcp.f32 %v1486_v60  ;;  %v1498_v9 = vand.u32 2147483648, %v1486_v60  ;;  %v1496_v12 = vand.u32 2147483647, %v1486_v60  ;;  %vm1492_vm9 = vweird.f32 %v1486_v60 }
 0x558   : > { %v1499_v14 = vor.u32 1.1754944e-38, %v1498_v9  ;;  %vm1497_vm11 = vcmp.eq.f32.partialorder %v1496_v12, 8.507059e+37 }
 0x55c   : > { %v2396_v3 = vpop.eup %2395 }
 0x55d   : > { %v1488_v4 = vmul.f32 %v2396_v3, %v1486_v60  ;;  %vm1493_vm8 = vweird.f32 %v2396_v3 }
 0x55e   : > { %vm1494_vm10 = vmor %vm1492_vm9, %vm1493_vm8 }
 0x55f   : > { %v1489_v6 = vsub.f32 1.0, %v1488_v4 }
 0x561   : > { %v1490_v11 = vmul.f32 %v2396_v3, %v1489_v6 }
 0x563   : > { %v1491_v13 = vadd.f32 %v2396_v3, %v1490_v11 }
 0x565   : > { %v1495_v16 = vsel %vm1494_vm10, %v2396_v3, %v1491_v13 }
 0x566   : > { %v1500_v17 = vsel %vm1497_vm11, %v1499_v14, %v1495_v16 }
 0x567   : > { %v1501_v19 = vmul.f32 %v2394_v18, %v1500_v17 }
 0x568   : > { %v1705_v20 = vpop.permute.xlu0 %1704 }
 0x569   : > { %v1732_v21 = vsel %vm452_vm0, %v1705_v20, 0  ;;  %2292 = vst.msk [vmem:[%s2959_s24 + $0x10] sm:$0xff] %vm452_vm0, %v1501_v19  ;;  %v1508_v22 = vsel %vm452_vm0, %v1501_v19, 0 }
 0x56a   : > { %v1753_v23 = vand.u32 4294901760, %v1732_v21  ;;  %v1527_v25 = vand.u32 4294901760, %v1508_v22 }
 0x56c   : > { %v1754_v28 = vsub.f32 %v1732_v21, %v1753_v23  ;;  %1558 = vmatmul.f32.vlgmr.msrb.gmra.mxu3 %v1527_v25  ;;  %v1528_v29 = vsub.f32 %v1508_v22, %v1527_v25 }
 0x56d   : > { %1828 = vmatpush.xpose.msrb.mxu3 %v1751_v35 }
 0x56e   : > { %v1755_v30 = vand.u32 4294901760, %v1754_v28  ;;  %1582 = vmatmul.f32.vlgmr.msra.gmra.mxu0 %v1528_v29  ;;  %v1529_v32 = vand.u32 4294901760, %v1528_v29 }
 0x56f   : > { %1854 = vmatpush.xpose.msra.mxu0 %v1779_v56 }
 0x570   : > { %v1756_v33 = vsub.f32 %v1754_v28, %v1755_v30  ;;  %1606 = vmatmul.f32.vlgmr.msra.gmra.mxu1 %v1529_v32  ;;  %v1659_v34 = vpop.permute.xlu0 %1658  ;;  %v1530_v36 = vsub.f32 %v1528_v29, %v1529_v32 }
 0x571   : > { %v1683_v37 = vsel %vm452_vm0, %v1659_v34, 0.0  ;;  %1876 = vmatpush.xpose.msra.mxu1 %v1751_v35 }
 0x572   : > { %v1757_v38 = vand.u32 4294901760, %v1756_v33  ;;  %1684 = vadd.xlane.f32.xlu1 %v1683_v37  ;;  %v1531_v39 = vand.u32 4294901760, %v1530_v36 }
 0x574   : > { %1532 = vmatmul.f32.vlgmr.msrb.gmra.mxu2 %v1531_v39  ;;  %1652 = vmatmul.f32.vlgmr.msra.gmra.mxu3 %v1527_v25 }
 0x575   : > { %1805 = vmatpush.xpose.msrb.mxu2 %v1778_v27 }
 0x576   : > { %1758 = vmatmul.f32.vlgmr.msrb.gmra.mxu0 %v1757_v38 }
 0x578   : > { %v1665_v41 = vpop.permute.xlu0 %1664  ;;  %1784 = vmatmul.f32.vlgmr.msrb.gmra.mxu1 %v1753_v23 }
 0x579   : > { %v1692_v42 = vsel %vm452_vm0, %v1665_v41, 0.0 }
 0x57a   : > { %1693 = vadd.xlane.f32.xlu1 %v1692_v42 }
 0x57c   : > { %1630 = vmatmul.f32.vlgmr.msra.gmra.mxu2 %v1527_v25  ;;  %1832 = vmatmul.f32.vlgmr.msrb.gmra.mxu3 %v1755_v30 }
 0x57e   : > { %1856 = vmatmul.f32.vlgmr.msra.gmra.mxu0 %v1753_v23 }
 0x580   : > { %v1671_v44 = vpop.permute.xlu0 %1670  ;;  %1878 = vmatmul.f32.vlgmr.msra.gmra.mxu1 %v1753_v23 }
 0x581   : > { %v1701_v46 = vsel %vm452_vm0, %v1671_v44, 0.0 }
 0x582   : > { %1702 = vadd.xlane.f32.xlu1 %v1701_v46 }
 0x583   : > { %v1682_v47 = vpop.xlane.xlu2 %1681 }
 0x584   : > { %1808 = vmatmul.f32.vlgmr.msrb.gmra.mxu2 %v1754_v28  ;;  %v1716_v50 = vperm.slane %v1682_v47, %v2894_v61 }
 0x58b   : > { %v1691_v51 = vpop.xlane.xlu2 %1690 }
 0x58c   : > { %v1719_v43 = vperm.slane %v1691_v51, %v2894_v61 }
 0x593   : > { %v1700_v27 = vpop.xlane.xlu2 %1699 }
 0x594   : > { %v1722_v58 = vperm.slane %v1700_v27, %v2894_v61 }
 0x59b   : > { %1909 = vrot.lane.b32.xlu1 %v2938_v45, %s2634_s12 }
 0x5ab   : > { %v1688_v49 = vpop.xlane.xlu0 %1687 }
 0x5ac   : > { %v1718_v2 = vperm.slane %v1688_v49, %v2894_v61 }
 0x5b3   : > { %v1697_v45 = vpop.xlane.xlu0 %1696 }
 0x5b4   : > { %v1721_v35 = vperm.slane %v1697_v45, %v2894_v61 }
 0x5e5   : > { %v1685_v48 = vpop.xlane.xlu1 %1684 }
 0x5e6   : > { %v1717_v18 = vperm.slane %v1685_v48, %v2894_v61 }
 0x5e8   : > { %v1724_v26 = vsel %vm495_vm1, %v1717_v18, %v1716_v50 }
 0x5e9   : > { %v1725_v53 = vsel %vm497_vm2, %v1718_v2, %v1724_v26 }
 0x5ea   : > { %v1726_v15 = vsel %vm499_vm3, %v1719_v43, %v1725_v53 }
 0x5eb   : > { %v1583_v54 = vpop.f32.mrf.mxu0 }
 0x5ed   : > { %v1694_v40 = vpop.xlane.xlu1 %1693  ;;  %v1607_v62 = vpop.f32.mrf.mxu1 }
 0x5ee   : > { %v1720_v52 = vperm.slane %v1694_v40, %v2894_v61 }
 0x5ef   : > { %v1559_v55 = vpop.f32.mrf.mxu3 }
 0x5f0   : > { %v1727_v56 = vsel %vm501_vm4, %v1720_v52, %v1726_v15 }
 0x5f1   : > { %v1728_v63 = vsel %vm503_vm5, %v1721_v35, %v1727_v56 }
 0x5f2   : > { %v1729_v3 = vsel %vm505_vm6, %v1722_v58, %v1728_v63 }
 0x5f3   : > { %v1759_v9 = vpop.f32.mrf.mxu0 }
 0x5f5   : > { %v1703_v59 = vpop.xlane.xlu1 %1702  ;;  %v1785_v12 = vpop.f32.mrf.mxu1 }
 0x5f6   : > { %v1723_v1 = vperm.slane %v1703_v59, %v2894_v61 }
 0x5f7   : > { %v1533_v57 = vpop.f32.mrf.mxu2  ;;  %v1653_v6 = vpop.f32.mrf.mxu3 }
 0x5f8   : > { %v1560_v60 = vadd.f32 %v1559_v55, %v1533_v57  ;;  %v1730_v5 = vsel %vm507_vm7, %v1723_v1, %v1729_v3 }
 0x5f9   : > { %v1760_v10 = vadd.f32 %v1759_v9, %v1730_v5 }
 0x5fa   : > { %v1584_v0 = vadd.f32 %v1583_v54, %v1560_v60 }
 0x5fb   : > { %v1786_v13 = vadd.f32 %v1785_v12, %v1760_v10  ;;  %v1857_v20 = vpop.f32.mrf.mxu0 }
 0x5fc   : > { %v1608_v4 = vadd.f32 %v1607_v62, %v1584_v0 }
 0x5fd   : > { %v1879_v61 = vpop.f32.mrf.mxu1 }
 0x5ff   : > { %v1631_v7 = vpop.f32.mrf.mxu2  ;;  %v1833_v17 = vpop.f32.mrf.mxu3 }
 0x600   : > { %v1632_v8 = vadd.f32 %v1631_v7, %v1608_v4 }
 0x602   : > { %v1654_v11 = vadd.f32 %v1653_v6, %v1632_v8 }
 0x607   : > { %v1809_v14 = vpop.f32.mrf.mxu2 }
 0x608   : > { %v1810_v16 = vadd.f32 %v1809_v14, %v1786_v13 }
 0x60a   : > { %v1834_v19 = vadd.f32 %v1833_v17, %v1810_v16 }
 0x60c   : > { %v1858_v21 = vadd.f32 %v1857_v20, %v1834_v19 }
 0x60d   : > { %v1910_v34 = vpop.permute.xlu1 %1909 }
 0x60e   : > { %v1880_v22 = vadd.f32 %v1879_v61, %v1858_v21  ;;  %v1930_v36 = vand.u32 4294901760, %v1910_v34 }
 0x610   : > { %v1882_v23 = vmul.f32 0.35355338, %v1880_v22  ;;  %v1957_v37 = vsub.f32 %v1910_v34, %v1930_v36  ;;  %1931 = vmatpush.msra.mxu2 %v1930_v36  ;;  %2007 = vmatpush.msrb.mxu1 %v1930_v36 }
 0x612   : > { %v1883_v25 = vsel %vm452_vm0, %v1882_v23, -inf  ;;  %v1958_v38 = vand.u32 4294901760, %v1957_v37  ;;  %1984 = vmatpush.msrb.mxu0 %v1957_v37 }
 0x613   : > { %1884 = vmax.xlane.f32.xlu0 %v1883_v25 }
 0x614   : > { %v1959_v39 = vsub.f32 %v1957_v37, %v1958_v38  ;;  %2033 = vmatpush.msrb.mxu2 %v1958_v38 }
 0x627   : > { %2062 = vrot.lane.b32.xlu0 %v3046_v31, %s2635_s20  ;;  %v1960_v31 = vand.u32 4294901760, %v1959_v39 }
 0x629   : > { %1961 = vmatpush.msra.mxu3 %v1960_v31 }
 0x62b   : > { %2055 = vmatpush.msrb.mxu3 %v1930_v36 }
 0x686   : > { %v1885_v28 = vpop.xlane.xlu0 %1884 }
 0x687   : > { %v1886_v29 = vsub.f32 %v1882_v23, %v1885_v28 }
 0x689   : > { %v1887_v30 = vmul.f32 1.442695, %v1886_v29 }
 0x68b   : > { %2397 = vpow2.f32 %v1887_v30 }
 0x691   : > { %v2398_v32 = vpop.eup %2397 }
 0x692   : > { %v1889_v33 = vsel %vm452_vm0, %v2398_v32, 0.0 }
 0x693   : > { %1890 = vadd.xlane.f32.xlu2 %v1889_v33 }
 0x6ab   : > { %2066 = vrot.lane.b32.xlu2 %v1654_v11, %s2636_s1 }
 0x706   : > { %v1891_v41 = vpop.xlane.xlu2 %1890 }
 0x707   : > { %2399 = vrcp.f32 %v1891_v41  ;;  %v1903_v47 = vand.u32 2147483648, %v1891_v41  ;;  %v1901_v49 = vand.u32 2147483647, %v1891_v41  ;;  %vm1897_vm2 = vweird.f32 %v1891_v41 }
 0x709   : > { %v1904_v18 = vor.u32 1.1754944e-38, %v1903_v47  ;;  %vm1902_vm4 = vcmp.eq.f32.partialorder %v1901_v49, 8.507059e+37 }
 0x70d   : > { %v2400_v42 = vpop.eup %2399 }
 0x70e   : > { %v1893_v44 = vmul.f32 %v2400_v42, %v1891_v41  ;;  %vm1898_vm1 = vweird.f32 %v2400_v42 }
 0x70f   : > { %vm1899_vm3 = vmor %vm1897_vm2, %vm1898_vm1 }
 0x710   : > { %v1894_v46 = vsub.f32 1.0, %v1893_v44 }
 0x712   : > { %v1895_v48 = vmul.f32 %v2400_v42, %v1894_v46 }
 0x714   : > { %v1896_v50 = vadd.f32 %v2400_v42, %v1895_v48 }
 0x716   : > { %v1900_v51 = vsel %vm1899_vm3, %v2400_v42, %v1896_v50 }
 0x717   : > { %v1905_v2 = vsel %vm1902_vm4, %v1904_v18, %v1900_v51 }
 0x718   : > { %v1906_v26 = vmul.f32 %v2398_v32, %v1905_v2 }
 0x71a   : > { %2293 = vst.msk [vmem:[%s2959_s24 + $0x18] sm:$0xff] %vm452_vm0, %v1906_v26  ;;  %v1913_v40 = vsel %vm452_vm0, %v1906_v26, 0 }
 0x71b   : > { %v1932_v43 = vand.u32 4294901760, %v1913_v40 }
 0x71d   : > { %1963 = vmatmul.f32.vlgmr.msra.gmra.mxu3 %v1932_v43  ;;  %v1933_v53 = vsub.f32 %v1913_v40, %v1932_v43 }
 0x71f   : > { %1987 = vmatmul.f32.vlgmr.msrb.gmra.mxu0 %v1933_v53  ;;  %v1934_v52 = vand.u32 4294901760, %v1933_v53 }
 0x721   : > { %2011 = vmatmul.f32.vlgmr.msrb.gmra.mxu1 %v1934_v52  ;;  %v1935_v45 = vsub.f32 %v1933_v53, %v1934_v52 }
 0x723   : > { %v1936_v15 = vand.u32 4294901760, %v1935_v45 }
 0x725   : > { %1937 = vmatmul.f32.vlgmr.msra.gmra.mxu2 %v1936_v15  ;;  %2057 = vmatmul.f32.vlgmr.msrb.gmra.mxu3 %v1932_v43 }
 0x72d   : > { %2035 = vmatmul.f32.vlgmr.msrb.gmra.mxu2 %v1932_v43 }
 0x79c   : > { %v1988_v56 = vpop.f32.mrf.mxu0 }
 0x79e   : > { %v2012_v57 = vpop.f32.mrf.mxu1 }
 0x7a0   : > { %v1964_v55 = vpop.f32.mrf.mxu3 }
 0x7a8   : > { %v1938_v35 = vpop.f32.mrf.mxu2 }
 0x7a9   : > { %v1965_v27 = vadd.f32 %v1964_v55, %v1938_v35 }
 0x7ab   : > { %v1989_v54 = vadd.f32 %v1988_v56, %v1965_v27 }
 0x7ac   : > { %2548 = shalt.err (!%p2545_p8)
}
 0x7ad   : > { %s2637_s24 = smov 128   ;;  %v2013_v58 = vadd.f32 %v2012_v57, %v1989_v54  ;;  %v2058_v62 = vpop.f32.mrf.mxu3  ;;  %s2638_s27 = smov 24   ;;  %v2063_v0 = vpop.permute.xlu0 %2062  ;;  %vm2074_vm5 = vcmask 130048   ;;  %vm2076_vm6 = vcmask 195584   ;;  %vm2078_vm7 = vcmask 261120  }
 0x7ae   : > { %2313 = dma.vmem_to_hbm [thread:$0]  (%p2718_p6), %s2113_s16, 512, %s2115_s29, %s2086_s18, %s2637_s24, %s2637_s24, %s2635_s20   ;;  %v2067_v1 = vpop.permute.xlu2 %2066  ;;  %v2073_v3 = vsel %vm452_vm0, %v2987_v24, %v2063_v0 }
 0x7af   : > { %s2296_s12 = sshll.u32 %s2700_s28, 3  ;;  %s391_s13 = scalar_lea.vmem [#allocation10], %s2829_s15  ;;  %v2075_v4 = vsel %vm2074_vm5, %v2073_v3, %v2067_v1 }
 0x7b0   : > { %v2036_v59 = vpop.f32.mrf.mxu2  ;;  %s2096_s21 = scalar_lea.hbm %s3166_s6, %s2296_s12  ;;  %s2098_s22 = sshll.u32 %s391_s13, 4  ;;  %s2099_s22 = int_to_ptr.vmem [resolvable:$true] %s2098_s22 }
 0x7b1   : > { %v2037_v60 = vadd.f32 %v2036_v59, %v2013_v58  ;;  %s2100_s20 = sshll.u32 %s2096_s21, 4  ;;  %s2081_s28 = scalar_lea.sflag [#allocation4], %s2826_s14  ;;  %s2101_s20 = int_to_ptr.hbm [resolvable:$true] %s2100_s20 }
 0x7b2   : > { %s2563_s16 = sshra.s32 %s2101_s20, 4  ;;  %s2569_s3 = scalar_lea.hbm %s3166_s6, 16  ;;  %s2564_s16 = int_to_ptr.hbm [resolvable:$true] %s2563_s16 }
 0x7b3   : > { %v2059_v63 = vadd.f32 %v2058_v62, %v2037_v60  ;;  %s2565_s29 = scalar_lea.hbm %s2564_s16, 8  ;;  %p2570_p4 = scmp.lt.s32.totalorder %s2564_s16, %s3166_s6 }
 0x7b4   : > { %p2566_p7 = scmp.ne.s32.totalorder %s2564_s16, %s2565_s29  ;;  %p2571_p5 = scmp.lt.s32.totalorder %s2569_s3, %s2565_s29 }
 0x7b5   : > { %2070 = vrot.lane.b32.xlu0 %v2059_v63, %s2638_s27 }
 0x7b6   : > { %p2567_p12 = pnand %p2566_p7, %p2718_p6  ;;  %p2572_p11 = por %p2571_p5, %p2570_p4 }
 0x7b8   : > { %p2568_p0 = pneg %p2567_p12 }
 0x7ba   : > { %p2573_p13 = pnand %p2572_p11, %p2568_p0 }
 0x827   : > { %v2071_v5 = vpop.permute.xlu0 %2070 }
 0x828   : > { %v2077_v6 = vsel %vm2076_vm6, %v2075_v4, %v2071_v5 }
 0x829   : > { %2079 = vst.msk [vmem:[%s391_s13] sm:$0xff] %vm2078_vm7, %v2077_v6 }
 0x82a   : > { %2576 = shalt.err (!%p2573_p13)
}
 0x82b   : > { %2312 = dma.vmem_to_hbm [thread:$0]  (%p2718_p6), %s2099_s22, 128, %s2101_s20, %s2081_s28  }
 0x82c PF: > { %s3189_s14 = sld [smem:[#allocation18_spill]] }
 0x82d   : > { %s3191_s8 = sld [smem:[#allocation19_spill]] }
 0x832   : > { %s2129_s23 = sand.u32 1, %s3189_s14  }
 0x833   : > { %p3192_p9 = scmp.ge.s32.totalorder %s3191_s8, 2  ;;  %s2130_s19 = scalar_lea.sflag [#allocation4], %s2129_s23 }
 0x835   : > { %p2331_p1 = pnand %p3192_p9, %p2727_p10 }
 0x837   : > { %p2332_p2 = pneg %p2331_p1 }
 0x839   : > { %2606 = dma.done.wait (%p2332_p2), %s2130_s19, 128  }
 0x83a   : > { %2608 = vsyncadd (%p2332_p2), %s2130_s19, 4294967168  ;;  %s2140_s24 = scalar_lea.sflag [#allocation12], %s2129_s23 }
 0x83b   : > { %2610 = dma.done.wait (%p2332_p2), %s2140_s24, 512  }
 0x83c   : > { %2612 = vsyncadd (%p2332_p2), %s2140_s24, 4294966784  ;;  %s3193_s27 = sld [smem:[#allocation20_spill]]  ;;  %s3195_s24 = smov %s2619_s25 }
 0x83d   : > { %s3194_s11 = sld [smem:[#allocation21_spill]]  ;;  %s3196_s25 = smov %s2623_s26 }
 0x842   : > { %p28_p6 = scmp.ge.s32.totalorder %s3193_s27, 4  }
 0x843   : > { %s3197_s26 = smov %s3194_s11 }
 0x844   :  { %30 = sbr.rel (!%p28_p6) target bundleno = 13 (0xd), region = 137 }
 0x849   :  { %2146 = vsyncpa [#allocation3], 1 }
 0x84a   :  { %2148 = vsyncpa [#allocation3 + $0x1], 1 }
 0x84b   :  { %2149 = vsyncpa [#allocation6], 1 }
 0x84c   :  { %2151 = vsyncpa [#allocation6 + $0x1], 1 }
 0x84d   :  { %2152 = vsyncpa [#allocation9], 1 }
 0x84e   :  { %2153 = vsyncpa [#allocation4], 1 }
 0x84f   :  { %2155 = vsyncpa [#allocation4 + $0x1], 1 }
 0x850   :  { %2156 = vsyncpa [#allocation12], 1 }
 0x851   :  { %2158 = vsyncpa [#allocation12 + $0x1], 1 }

</bundles_post_ra>
